<compile_context>
chip_gen: v6e
topology: v6e:2x2x1
jax: 0.10.0
libtpu: 0.0.40
codegen_flags: <defaults>
</compile_context>

<pallas_src>
import jax
import jax.numpy as jnp
from jax import lax
from jax.experimental import pallas as pl
from jax.experimental.pallas import tpu as pltpu

LEAKY_SLOPE = 0.2                 # NLayerLeakyMLP uses nn.LeakyReLU(0.2)
HIDDEN = 64                       # hidden_dim default of the module
H_PAD = 128                       # hidden padded to full lane width / MXU tile
TN_MAX = 1024                     # max rows per grid step
MATMUL_DTYPE = jnp.bfloat16       # MXU operand dtype (set to jnp.float32 for parity)


def _round_up(a, b):
    return ((a + b - 1) // b) * b


# ---------------------------------------------------------------------------
# Fused Pallas kernel: forward MLP + analytic gradient; grid = (row_tile, comp)
# ---------------------------------------------------------------------------
def fused_mlp_kernel(x_ref, scale_ref, w0_ref, b0_ref, w1_ref, b1_ref,
                     w2_ref, b2_ref, w3r_ref, w0diag_ref, w1t_ref, w2t_ref,
                     w0t_ref, out_ref):
    c = pl.program_id(1)                              # component index
    dmax = x_ref.shape[-1]

    # per-component masked input (scale rows built host-side from cumprod(mask))
    x = x_ref[...] * scale_ref[c]                     # (TN, Dmax) f32
    xb = x.astype(w0_ref.dtype)

    # ----- forward: Linear -> LeakyReLU(0.2) x3, then scalar head (no bias) --
    h0 = jnp.dot(xb, w0_ref[c], preferred_element_type=jnp.float32) + b0_ref[c]
    d0 = jnp.where(h0 > 0, 1.0, LEAKY_SLOPE)
    h1 = jnp.dot((h0 * d0).astype(w1_ref.dtype), w1_ref[c],
                 preferred_element_type=jnp.float32) + b1_ref[c]
    d1 = jnp.where(h1 > 0, 1.0, LEAKY_SLOPE)
    h2 = jnp.dot((h1 * d1).astype(w2_ref.dtype), w2_ref[c],
                 preferred_element_type=jnp.float32) + b2_ref[c]
    d2 = jnp.where(h2 > 0, 1.0, LEAKY_SLOPE)

    w3r = w3r_ref[c]                                  # (1, H) f32  == w3.T
    g2 = d2 * w3r                                     # (TN, H)
    res = jnp.sum(h2 * g2, axis=-1, keepdims=True)    # == a2 @ w3 ; b3 in wrapper

    # ----- analytic per-row gradient d res / d x (the 1xD Jacobian) ----------
    g1 = d1 * jnp.dot(g2.astype(w2t_ref.dtype), w2t_ref[c],
                      preferred_element_type=jnp.float32)
    g0 = d0 * jnp.dot(g1.astype(w1t_ref.dtype), w1t_ref[c],
                      preferred_element_type=jnp.float32)
    gx = jnp.dot(g0.astype(w0t_ref.dtype), w0t_ref[c],
                 preferred_element_type=jnp.float32)  # (TN, OUT_W)

    # diagonal Jacobian entry via the precomputed w0 row (f32, no lane select)
    diag = jnp.sum(g0 * w0diag_ref[c], axis=-1, keepdims=True)
    logdet = jnp.log(jnp.abs(diag))                   # (TN, 1)

    # lane-dense packed output slab: [grad | res | logdet | zeros]
    tn, out_w = out_ref.shape
    lane = lax.broadcasted_iota(jnp.int32, (tn, out_w), 1)
    out_ref[...] = jnp.where(lane == dmax, res,
                             jnp.where(lane == dmax + 1, logdet, gx))


def _choose_tn(n, dmax, out_w, hpad, weight_bytes, budget=12 * 2**20):
    """VMEM-aware row-tile chooser (multiples of 128, up to TN_MAX)."""
    tn = min(TN_MAX, _round_up(n, 128))
    while tn > 128:
        io_bytes = 2 * tn * (dmax + out_w) * 4            # double-buffered x + out
        tmp_bytes = 10 * tn * hpad * 4                    # rough live intermediates
        if io_bytes + tmp_bytes + 2 * weight_bytes <= budget:
            break
        tn //= 2
    return max(tn, 128)


def fused_mlp_forward_and_grad(base, scale, stacked, tn):
    """base: (n_pad, dmax) f32; scale: (C,1,dmax) f32. Returns (C, n_pad, out_w)."""
    (W0, B0, W1, B1, W2, B2, W3r, W0diag, W1t, W2t, W0t) = stacked
    C, dmax, hpad = W0.shape
    out_w = W0t.shape[-1]
    n_pad = base.shape[0]
    n_tiles = n_pad // tn

    weight_bytes = sum(int(a.size) * a.dtype.itemsize for a in stacked)

    def cres(arr):  # full-C VMEM-resident block, constant index map
        return pl.BlockSpec(arr.shape, lambda t, c: (0, 0, 0))

    cost = pl.CostEstimate(
        flops=int(2 * C * n_pad * (dmax * hpad + 4 * hpad * hpad + hpad * out_w)),
        transcendentals=int(C * n_pad),
        bytes_accessed=int(n_pad * dmax * 4 + C * n_pad * out_w * 4 + weight_bytes),
    )

    return pl.pallas_call(
        fused_mlp_kernel,
        out_shape=jax.ShapeDtypeStruct((C, n_pad, out_w), jnp.float32),
        grid_spec=pltpu.PrefetchScalarGridSpec(
            num_scalar_prefetch=0,
            grid=(n_tiles, C),                          # row tiles outer, comps inner
            in_specs=[
                pl.BlockSpec((tn, dmax), lambda t, c: (t, 0)),   # shared base input
                cres(scale),
                cres(W0), cres(B0), cres(W1), cres(B1), cres(W2), cres(B2),
                cres(W3r), cres(W0diag), cres(W1t), cres(W2t), cres(W0t),
            ],
            out_specs=pl.BlockSpec((None, tn, out_w), lambda t, c: (c, t, 0)),
        ),
        compiler_params=pltpu.CompilerParams(
            dimension_semantics=("parallel", "parallel"),
            vmem_limit_bytes=32 * 1024 * 1024),
        cost_estimate=cost,
    )(base, scale, W0, B0, W1, B1, W2, B2, W3r, W0diag, W1t, W2t, W0t)


# ---------------------------------------------------------------------------
# Parameter construction (deterministic, synthetic) + host-side stacking
# ---------------------------------------------------------------------------
def init_params(key, lags, latent_size, hidden_dim=HIDDEN):
    """One 3-hidden-layer MLP (in -> H -> H -> H -> 1) per latent component."""
    params_list = []
    for i in range(latent_size):
        d_in = lags * latent_size + 1 + i
        dims = [(d_in, hidden_dim), (hidden_dim, hidden_dim),
                (hidden_dim, hidden_dim), (hidden_dim, 1)]
        layer_params = []
        for fi, fo in dims:
            key, kw, kb = jax.random.split(key, 3)
            scale = 1.0 / jnp.sqrt(jnp.float32(fi))
            layer_params.append(jax.random.uniform(kw, (fi, fo), jnp.float32,
                                                   -scale, scale))
            layer_params.append(jax.random.uniform(kb, (1, fo), jnp.float32,
                                                   -scale, scale))
        params_list.append(tuple(layer_params))
    key, ku = jax.random.split(key)
    u = 0.1 * jax.random.normal(ku, (latent_size, latent_size), jnp.float32)
    return params_list, u


def stack_params(params_list, lags, latent_size, hidden=HIDDEN, hpad=H_PAD,
                 matmul_dtype=MATMUL_DTYPE):
    """Zero-pad every component's weights to (dmax, hpad) and stack along C."""
    C = latent_size
    ld = lags * latent_size
    dmax = ld + latent_size
    out_w = _round_up(dmax + 2, 128)      # grad cols + res col + logdet col, lane-dense

    W0 = jnp.zeros((C, dmax, hpad), jnp.float32)
    B0 = jnp.zeros((C, 1, hpad), jnp.float32)
    W1 = jnp.zeros((C, hpad, hpad), jnp.float32)
    B1 = jnp.zeros((C, 1, hpad), jnp.float32)
    W2 = jnp.zeros((C, hpad, hpad), jnp.float32)
    B2 = jnp.zeros((C, 1, hpad), jnp.float32)
    W3r = jnp.zeros((C, 1, hpad), jnp.float32)
    W0diag = jnp.zeros((C, 1, hpad), jnp.float32)
    W1t = jnp.zeros((C, hpad, hpad), jnp.float32)
    W2t = jnp.zeros((C, hpad, hpad), jnp.float32)
    W0t = jnp.zeros((C, hpad, out_w), jnp.float32)
    b3_vec = jnp.zeros((C,), jnp.float32)

    for i, p in enumerate(params_list):
        w0, b0, w1, b1, w2, b2, w3, b3 = p
        d_i = w0.shape[0]                               # = ld + 1 + i
        W0 = W0.at[i, :d_i, :hidden].set(w0)
        W0t = W0t.at[i, :hidden, :d_i].set(w0.T)
        W0diag = W0diag.at[i, 0, :hidden].set(w0[ld + i, :])
        B0 = B0.at[i, 0, :hidden].set(b0[0])
        W1 = W1.at[i, :hidden, :hidden].set(w1)
        W1t = W1t.at[i, :hidden, :hidden].set(w1.T)
        B1 = B1.at[i, 0, :hidden].set(b1[0])
        W2 = W2.at[i, :hidden, :hidden].set(w2)
        W2t = W2t.at[i, :hidden, :hidden].set(w2.T)
        B2 = B2.at[i, 0, :hidden].set(b2[0])
        W3r = W3r.at[i, 0, :hidden].set(w3[:, 0])
        b3_vec = b3_vec.at[i].set(b3[0, 0])

    stacked = (W0.astype(matmul_dtype), B0,
               W1.astype(matmul_dtype), B1,
               W2.astype(matmul_dtype), B2,
               W3r, W0diag,
               W1t.astype(matmul_dtype), W2t.astype(matmul_dtype),
               W0t.astype(matmul_dtype))
    return stacked, b3_vec, dmax, out_w


# ---------------------------------------------------------------------------
# Forward pass (mirrors NPInstantaneousTransitionPrior.forward)
# ---------------------------------------------------------------------------
def np_instantaneous_transition_prior_forward(x, params_list, u, noise_key,
                                              lags, tau=0.3):
    batch, length, D = x.shape
    L = lags
    n_win = length - L
    n = batch * n_win
    ld = L * D

    # unfold(dim=1, size=L+1, step=1) + swapaxes(2,3) -> (batch, n_win, L+1, D)
    win_idx = jnp.arange(n_win)[:, None] + jnp.arange(L + 1)[None, :]
    xw = x[:, win_idx, :].reshape(n, L + 1, D)
    xx = xw[:, -1, :]                                 # (N, D)   current step
    yy = xw[:, :-1, :].reshape(n, ld)                 # (N, L*D) history

    # sample_mask(u, tau): gumbel-sigmoid with logistic noise, diagonal zeroed
    U = jax.random.uniform(noise_key, u.shape, jnp.float32, 1e-6, 1.0 - 1e-6)
    logistic_noise = jnp.log(U) - jnp.log(1.0 - U)
    mask = jax.nn.sigmoid((u + logistic_noise) / tau)
    mask = mask * (jnp.ones((D, D), jnp.float32) - jnp.eye(D, dtype=jnp.float32))

    stacked, b3_vec, dmax, out_w = stack_params(params_list, lags, D)

    # VMEM-aware row tile / padded row count
    weight_bytes = sum(int(a.size) * a.dtype.itemsize for a in stacked)
    tn = _choose_tn(n, dmax, out_w, H_PAD, weight_bytes)
    n_pad = _round_up(n, tn)

    # single shared base input + per-component scale rows (cumulative masking,
    # matching the torch loop's in-place yy[:, -D:] *= mask[i])
    base = jnp.concatenate([yy, xx], axis=-1)                     # (N, dmax)
    base = jnp.pad(base, ((0, n_pad - n), (0, 0)))
    cum_mask = jnp.cumprod(mask, axis=0)                          # (D, D)
    scale = jnp.ones((D, 1, dmax), jnp.float32)
    scale = scale.at[:, 0, ld - D:ld].set(cum_mask)

    packed = fused_mlp_forward_and_grad(base, scale, stacked, tn)  # (D, n_pad, out_w)

    # NOTE: padded rows are always sliced off (:n) BEFORE any reduction.
    res = packed[:, :n, dmax]                                      # (D, N)
    logdet = packed[:, :n, dmax + 1]                               # (D, N)

    residuals = (res.T + b3_vec[None, :]).reshape(batch, n_win, D)
    sum_log_abs_det_jacobian = jnp.sum(
        jnp.sum(logdet, axis=0).reshape(batch, n_win), axis=1)
    hist_jac = [packed[i, :n, :ld + i][:, None, :] for i in range(D)]
    return residuals, sum_log_abs_det_jacobian, hist_jac


# ---------------------------------------------------------------------------
# Pure-JAX reference (vmap(jacfwd), same bf16 matmul operands) for validation
# ---------------------------------------------------------------------------
def _reference_forward(x, params_list, u, noise_key, lags, tau=0.3,
                       matmul_dtype=MATMUL_DTYPE):
    batch, length, D = x.shape
    L = lags
    n_win = length - L
    n = batch * n_win
    win_idx = jnp.arange(n_win)[:, None] + jnp.arange(L + 1)[None, :]
    xw = x[:, win_idx, :].reshape(n, L + 1, D)
    xx = xw[:, -1, :]
    yy = xw[:, :-1, :].reshape(n, L * D)
    U = jax.random.uniform(noise_key, u.shape, jnp.float32, 1e-6, 1.0 - 1e-6)
    noise = jnp.log(U) - jnp.log(1.0 - U)
    mask = jax.nn.sigmoid((u + noise) / tau)
    mask = mask * (jnp.ones((D, D), jnp.float32) - jnp.eye(D, dtype=jnp.float32))

    residuals, hist, s = [], [], jnp.zeros((n,), jnp.float32)
    for i in range(D):
        yy = yy.at[:, -D:].multiply(mask[i])
        inp = jnp.concatenate([yy, xx[:, :i + 1]], axis=-1)

        w0, b0, w1, b1, w2, b2, w3, b3 = params_list[i]
        w0m = w0.astype(matmul_dtype)
        w1m = w1.astype(matmul_dtype)
        w2m = w2.astype(matmul_dtype)

        def g(z, w0m=w0m, w1m=w1m, w2m=w2m, b0=b0, b1=b1, b2=b2, w3=w3, b3=b3):
            h = jnp.dot(z.astype(matmul_dtype), w0m,
                        preferred_element_type=jnp.float32) + b0[0]
            h = jnp.where(h > 0, h, LEAKY_SLOPE * h)
            h = jnp.dot(h.astype(matmul_dtype), w1m,
                        preferred_element_type=jnp.float32) + b1[0]
            h = jnp.where(h > 0, h, LEAKY_SLOPE * h)
            h = jnp.dot(h.astype(matmul_dtype), w2m,
                        preferred_element_type=jnp.float32) + b2[0]
            h = jnp.where(h > 0, h, LEAKY_SLOPE * h)
            return (jnp.dot(h, w3) + b3[0])[0]           # head kept in f32

        res = jax.vmap(g)(inp)
        jac = jax.vmap(jax.jacfwd(g))(inp)
        residuals.append(res[:, None])
        hist.append(jac[:, None, :-1])
        s = s + jnp.log(jnp.abs(jac[:, -1]))
    residuals = jnp.concatenate(residuals, axis=-1).reshape(batch, n_win, D)
    s = jnp.sum(s.reshape(batch, n_win), axis=1)
    return residuals, s, hist


# ---------------------------------------------------------------------------
if __name__ == "__main__":
    lags = 2
    latent_size = 4
    batch, length = 2, 8

    key = jax.random.PRNGKey(0)
    k_params, k_x, k_noise = jax.random.split(key, 3)

    params_list, u = init_params(k_params, lags, latent_size)
    x = jax.random.normal(k_x, (batch, length, latent_size), jnp.float32)

    residuals, sum_logdet, hist_jac = np_instantaneous_transition_prior_forward(
        x, params_list, u, k_noise, lags)

    jax.block_until_ready(residuals)
    jax.block_until_ready(sum_logdet)
    for h in hist_jac:
        jax.block_until_ready(h)

    assert residuals.shape == (batch, length - lags, latent_size)
    assert sum_logdet.shape == (batch,)
    assert len(hist_jac) == latent_size
    for i, h in enumerate(hist_jac):
        assert h.shape == (batch * (length - lags), 1, lags * latent_size + i)
    assert bool(jnp.all(jnp.isfinite(residuals)))
    assert bool(jnp.all(jnp.isfinite(sum_logdet)))

    # correctness vs pure-JAX vmap(jacfwd) reference using the same bf16
    # matmul operands (tolerances account for fwd- vs rev-mode bf16 rounding)
    ref_res, ref_sum, ref_hist = _reference_forward(x, params_list, u, k_noise, lags)
    assert bool(jnp.allclose(residuals, ref_res, rtol=2e-2, atol=2e-3))
    assert bool(jnp.allclose(sum_logdet, ref_sum, rtol=3e-2, atol=1.0))
    for h, rh in zip(hist_jac, ref_hist):
        assert bool(jnp.allclose(h, rh, rtol=3e-2, atol=1e-2))

    print("KERNEL_OK")
</pallas_src>

<mosaic_0001>
module attributes {stable_mosaic.version = 11 : i64} {
  func.func @fused_mlp_kernel(%arg0: i32, %arg1: i32, %arg2: memref<128x12xf32, #tpu.memory_space<vmem>>, %arg3: memref<4x1x12xf32, #tpu.memory_space<vmem>>, %arg4: memref<4x12x128xbf16, #tpu.memory_space<vmem>>, %arg5: memref<4x1x128xf32, #tpu.memory_space<vmem>>, %arg6: memref<4x128x128xbf16, #tpu.memory_space<vmem>>, %arg7: memref<4x1x128xf32, #tpu.memory_space<vmem>>, %arg8: memref<4x128x128xbf16, #tpu.memory_space<vmem>>, %arg9: memref<4x1x128xf32, #tpu.memory_space<vmem>>, %arg10: memref<4x1x128xf32, #tpu.memory_space<vmem>>, %arg11: memref<4x1x128xf32, #tpu.memory_space<vmem>>, %arg12: memref<4x128x128xbf16, #tpu.memory_space<vmem>>, %arg13: memref<4x128x128xbf16, #tpu.memory_space<vmem>>, %arg14: memref<4x128x128xbf16, #tpu.memory_space<vmem>>, %arg15: memref<1x128x128xf32, #tpu.memory_space<vmem>>) attributes {dimension_semantics = [#tpu.dimension_semantics<parallel>, #tpu.dimension_semantics<parallel>], iteration_bounds = array<i64: 1, 4>, scalar_prefetch = 0 : i64, scratch_operands = 0 : i64, tpu.core_type = #tpu.core_type<tc>, window_params = [{transform_indices = @transform_0, window_bounds = array<i64: 128, 12>}, {pipeline_mode = #tpu.pipeline_mode<synchronous>, transform_indices = @transform_1, window_bounds = array<i64: 4, 1, 12>}, {pipeline_mode = #tpu.pipeline_mode<synchronous>, transform_indices = @transform_2, window_bounds = array<i64: 4, 12, 128>}, {pipeline_mode = #tpu.pipeline_mode<synchronous>, transform_indices = @transform_3, window_bounds = array<i64: 4, 1, 128>}, {pipeline_mode = #tpu.pipeline_mode<synchronous>, transform_indices = @transform_4, window_bounds = array<i64: 4, 128, 128>}, {pipeline_mode = #tpu.pipeline_mode<synchronous>, transform_indices = @transform_5, window_bounds = array<i64: 4, 1, 128>}, {pipeline_mode = #tpu.pipeline_mode<synchronous>, transform_indices = @transform_6, window_bounds = array<i64: 4, 128, 128>}, {pipeline_mode = #tpu.pipeline_mode<synchronous>, transform_indices = @transform_7, window_bounds = array<i64: 4, 1, 128>}, {pipeline_mode = #tpu.pipeline_mode<synchronous>, transform_indices = @transform_8, window_bounds = array<i64: 4, 1, 128>}, {pipeline_mode = #tpu.pipeline_mode<synchronous>, transform_indices = @transform_9, window_bounds = array<i64: 4, 1, 128>}, {pipeline_mode = #tpu.pipeline_mode<synchronous>, transform_indices = @transform_10, window_bounds = array<i64: 4, 128, 128>}, {pipeline_mode = #tpu.pipeline_mode<synchronous>, transform_indices = @transform_11, window_bounds = array<i64: 4, 128, 128>}, {pipeline_mode = #tpu.pipeline_mode<synchronous>, transform_indices = @transform_12, window_bounds = array<i64: 4, 128, 128>}, {transform_indices = @transform_13, window_bounds = array<i64: 1, 128, 128>}]} {
    %c0 = arith.constant 0 : index
    %c0_0 = arith.constant 0 : index
    %0 = vector.load %arg2[%c0, %c0_0] : memref<128x12xf32, #tpu.memory_space<vmem>>, vector<128x12xf32>
    %1 = arith.index_cast %arg1 : i32 to index
    %c0_1 = arith.constant 0 : index
    %c0_2 = arith.constant 0 : index
    %2 = vector.load %arg3[%1, %c0_1, %c0_2] : memref<4x1x12xf32, #tpu.memory_space<vmem>>, vector<1x1x12xf32>
    %3 = vector.shape_cast %2 : vector<1x1x12xf32> to vector<1x12xf32>
    %4 = vector.broadcast %3 : vector<1x12xf32> to vector<128x12xf32>
    %5 = arith.mulf %0, %4 : vector<128x12xf32>
    %6 = arith.truncf %5 : vector<128x12xf32> to vector<128x12xbf16>
    %7 = arith.index_cast %arg1 : i32 to index
    %c0_3 = arith.constant 0 : index
    %c0_4 = arith.constant 0 : index
    %8 = vector.load %arg4[%7, %c0_3, %c0_4] : memref<4x12x128xbf16, #tpu.memory_space<vmem>>, vector<1x12x128xbf16>
    %9 = vector.shape_cast %8 : vector<1x12x128xbf16> to vector<12x128xbf16>
    %cst = arith.constant dense<0.000000e+00> : vector<128x128xf32>
    %10 = tpu.matmul %6, %9, %cst {dimension_numbers = #tpu.dot_dimension_numbers<[1], [0], [0], [1], [0, 0, 1, 1], [], []>} : vector<128x12xbf16>, vector<12x128xbf16>, vector<128x128xf32> -> vector<128x128xf32>
    %11 = arith.index_cast %arg1 : i32 to index
    %c0_5 = arith.constant 0 : index
    %c0_6 = arith.constant 0 : index
    %12 = vector.load %arg5[%11, %c0_5, %c0_6] : memref<4x1x128xf32, #tpu.memory_space<vmem>>, vector<1x1x128xf32>
    %13 = vector.shape_cast %12 : vector<1x1x128xf32> to vector<1x128xf32>
    %14 = vector.broadcast %13 : vector<1x128xf32> to vector<128x128xf32>
    %15 = arith.addf %10, %14 : vector<128x128xf32>
    %cst_7 = arith.constant 0.000000e+00 : f32
    %16 = vector.broadcast %cst_7 : f32 to vector<128x128xf32>
    %17 = arith.cmpf ogt, %15, %16 : vector<128x128xf32>
    %cst_8 = arith.constant 1.000000e+00 : f32
    %cst_9 = arith.constant 2.000000e-01 : f32
    %18 = vector.broadcast %cst_8 : f32 to vector<128x128xf32>
    %19 = vector.broadcast %cst_9 : f32 to vector<128x128xf32>
    %20 = arith.select %17, %18, %19 : vector<128x128xi1>, vector<128x128xf32>
    %21 = arith.mulf %15, %20 : vector<128x128xf32>
    %22 = arith.truncf %21 : vector<128x128xf32> to vector<128x128xbf16>
    %23 = arith.index_cast %arg1 : i32 to index
    %c0_10 = arith.constant 0 : index
    %c0_11 = arith.constant 0 : index
    %24 = vector.load %arg6[%23, %c0_10, %c0_11] : memref<4x128x128xbf16, #tpu.memory_space<vmem>>, vector<1x128x128xbf16>
    %25 = vector.shape_cast %24 : vector<1x128x128xbf16> to vector<128x128xbf16>
    %cst_12 = arith.constant dense<0.000000e+00> : vector<128x128xf32>
    %26 = tpu.matmul %22, %25, %cst_12 {dimension_numbers = #tpu.dot_dimension_numbers<[1], [0], [0], [1], [0, 0, 1, 1], [], []>} : vector<128x128xbf16>, vector<128x128xbf16>, vector<128x128xf32> -> vector<128x128xf32>
    %27 = arith.index_cast %arg1 : i32 to index
    %c0_13 = arith.constant 0 : index
    %c0_14 = arith.constant 0 : index
    %28 = vector.load %arg7[%27, %c0_13, %c0_14] : memref<4x1x128xf32, #tpu.memory_space<vmem>>, vector<1x1x128xf32>
    %29 = vector.shape_cast %28 : vector<1x1x128xf32> to vector<1x128xf32>
    %30 = vector.broadcast %29 : vector<1x128xf32> to vector<128x128xf32>
    %31 = arith.addf %26, %30 : vector<128x128xf32>
    %cst_15 = arith.constant 0.000000e+00 : f32
    %32 = vector.broadcast %cst_15 : f32 to vector<128x128xf32>
    %33 = arith.cmpf ogt, %31, %32 : vector<128x128xf32>
    %cst_16 = arith.constant 1.000000e+00 : f32
    %cst_17 = arith.constant 2.000000e-01 : f32
    %34 = vector.broadcast %cst_16 : f32 to vector<128x128xf32>
    %35 = vector.broadcast %cst_17 : f32 to vector<128x128xf32>
    %36 = arith.select %33, %34, %35 : vector<128x128xi1>, vector<128x128xf32>
    %37 = arith.mulf %31, %36 : vector<128x128xf32>
    %38 = arith.truncf %37 : vector<128x128xf32> to vector<128x128xbf16>
    %39 = arith.index_cast %arg1 : i32 to index
    %c0_18 = arith.constant 0 : index
    %c0_19 = arith.constant 0 : index
    %40 = vector.load %arg8[%39, %c0_18, %c0_19] : memref<4x128x128xbf16, #tpu.memory_space<vmem>>, vector<1x128x128xbf16>
    %41 = vector.shape_cast %40 : vector<1x128x128xbf16> to vector<128x128xbf16>
    %cst_20 = arith.constant dense<0.000000e+00> : vector<128x128xf32>
    %42 = tpu.matmul %38, %41, %cst_20 {dimension_numbers = #tpu.dot_dimension_numbers<[1], [0], [0], [1], [0, 0, 1, 1], [], []>} : vector<128x128xbf16>, vector<128x128xbf16>, vector<128x128xf32> -> vector<128x128xf32>
    %43 = arith.index_cast %arg1 : i32 to index
    %c0_21 = arith.constant 0 : index
    %c0_22 = arith.constant 0 : index
    %44 = vector.load %arg9[%43, %c0_21, %c0_22] : memref<4x1x128xf32, #tpu.memory_space<vmem>>, vector<1x1x128xf32>
    %45 = vector.shape_cast %44 : vector<1x1x128xf32> to vector<1x128xf32>
    %46 = vector.broadcast %45 : vector<1x128xf32> to vector<128x128xf32>
    %47 = arith.addf %42, %46 : vector<128x128xf32>
    %cst_23 = arith.constant 0.000000e+00 : f32
    %48 = vector.broadcast %cst_23 : f32 to vector<128x128xf32>
    %49 = arith.cmpf ogt, %47, %48 : vector<128x128xf32>
    %cst_24 = arith.constant 1.000000e+00 : f32
    %cst_25 = arith.constant 2.000000e-01 : f32
    %50 = vector.broadcast %cst_24 : f32 to vector<128x128xf32>
    %51 = vector.broadcast %cst_25 : f32 to vector<128x128xf32>
    %52 = arith.select %49, %50, %51 : vector<128x128xi1>, vector<128x128xf32>
    %53 = arith.index_cast %arg1 : i32 to index
    %c0_26 = arith.constant 0 : index
    %c0_27 = arith.constant 0 : index
    %54 = vector.load %arg10[%53, %c0_26, %c0_27] : memref<4x1x128xf32, #tpu.memory_space<vmem>>, vector<1x1x128xf32>
    %55 = vector.shape_cast %54 : vector<1x1x128xf32> to vector<1x128xf32>
    %56 = vector.broadcast %55 : vector<1x128xf32> to vector<128x128xf32>
    %57 = arith.mulf %52, %56 : vector<128x128xf32>
    %58 = arith.mulf %47, %57 : vector<128x128xf32>
    %cst_28 = arith.constant dense<0.000000e+00> : vector<128xf32>
    %59 = vector.multi_reduction <add>, %58, %cst_28 [1] : vector<128x128xf32> to vector<128xf32>
    %60 = vector.shape_cast %59 : vector<128xf32> to vector<128x1xf32>
    %61 = arith.truncf %57 : vector<128x128xf32> to vector<128x128xbf16>
    %62 = arith.index_cast %arg1 : i32 to index
    %c0_29 = arith.constant 0 : index
    %c0_30 = arith.constant 0 : index
    %63 = vector.load %arg13[%62, %c0_29, %c0_30] : memref<4x128x128xbf16, #tpu.memory_space<vmem>>, vector<1x128x128xbf16>
    %64 = vector.shape_cast %63 : vector<1x128x128xbf16> to vector<128x128xbf16>
    %cst_31 = arith.constant dense<0.000000e+00> : vector<128x128xf32>
    %65 = tpu.matmul %61, %64, %cst_31 {dimension_numbers = #tpu.dot_dimension_numbers<[1], [0], [0], [1], [0, 0, 1, 1], [], []>} : vector<128x128xbf16>, vector<128x128xbf16>, vector<128x128xf32> -> vector<128x128xf32>
    %66 = arith.mulf %36, %65 : vector<128x128xf32>
    %67 = arith.truncf %66 : vector<128x128xf32> to vector<128x128xbf16>
    %68 = arith.index_cast %arg1 : i32 to index
    %c0_32 = arith.constant 0 : index
    %c0_33 = arith.constant 0 : index
    %69 = vector.load %arg12[%68, %c0_32, %c0_33] : memref<4x128x128xbf16, #tpu.memory_space<vmem>>, vector<1x128x128xbf16>
    %70 = vector.shape_cast %69 : vector<1x128x128xbf16> to vector<128x128xbf16>
    %cst_34 = arith.constant dense<0.000000e+00> : vector<128x128xf32>
    %71 = tpu.matmul %67, %70, %cst_34 {dimension_numbers = #tpu.dot_dimension_numbers<[1], [0], [0], [1], [0, 0, 1, 1], [], []>} : vector<128x128xbf16>, vector<128x128xbf16>, vector<128x128xf32> -> vector<128x128xf32>
    %72 = arith.mulf %20, %71 : vector<128x128xf32>
    %73 = arith.truncf %72 : vector<128x128xf32> to vector<128x128xbf16>
    %74 = arith.index_cast %arg1 : i32 to index
    %c0_35 = arith.constant 0 : index
    %c0_36 = arith.constant 0 : index
    %75 = vector.load %arg14[%74, %c0_35, %c0_36] : memref<4x128x128xbf16, #tpu.memory_space<vmem>>, vector<1x128x128xbf16>
    %76 = vector.shape_cast %75 : vector<1x128x128xbf16> to vector<128x128xbf16>
    %cst_37 = arith.constant dense<0.000000e+00> : vector<128x128xf32>
    %77 = tpu.matmul %73, %76, %cst_37 {dimension_numbers = #tpu.dot_dimension_numbers<[1], [0], [0], [1], [0, 0, 1, 1], [], []>} : vector<128x128xbf16>, vector<128x128xbf16>, vector<128x128xf32> -> vector<128x128xf32>
    %78 = arith.index_cast %arg1 : i32 to index
    %c0_38 = arith.constant 0 : index
    %c0_39 = arith.constant 0 : index
    %79 = vector.load %arg11[%78, %c0_38, %c0_39] : memref<4x1x128xf32, #tpu.memory_space<vmem>>, vector<1x1x128xf32>
    %80 = vector.shape_cast %79 : vector<1x1x128xf32> to vector<1x128xf32>
    %81 = vector.broadcast %80 : vector<1x128xf32> to vector<128x128xf32>
    %82 = arith.mulf %72, %81 : vector<128x128xf32>
    %cst_40 = arith.constant dense<0.000000e+00> : vector<128xf32>
    %83 = vector.multi_reduction <add>, %82, %cst_40 [1] : vector<128x128xf32> to vector<128xf32>
    %84 = vector.shape_cast %83 : vector<128xf32> to vector<128x1xf32>
    %85 = math.absf %84 : vector<128x1xf32>
    %86 = math.log %85 : vector<128x1xf32>
    %87 = tpu.iota {dimensions = array<i32: 1>} : vector<128x128xi32>
    %c12_i32 = arith.constant 12 : i32
    %88 = vector.broadcast %c12_i32 : i32 to vector<128x128xi32>
    %89 = arith.cmpi eq, %87, %88 : vector<128x128xi32>
    %c13_i32 = arith.constant 13 : i32
    %90 = vector.broadcast %c13_i32 : i32 to vector<128x128xi32>
    %91 = arith.cmpi eq, %87, %90 : vector<128x128xi32>
    %92 = vector.shape_cast %86 : vector<128x1xf32> to vector<128x1xf32>
    %93 = vector.broadcast %92 : vector<128x1xf32> to vector<128x128xf32>
    %94 = arith.select %91, %93, %77 : vector<128x128xi1>, vector<128x128xf32>
    %95 = vector.shape_cast %60 : vector<128x1xf32> to vector<128x1xf32>
    %96 = vector.broadcast %95 : vector<128x1xf32> to vector<128x128xf32>
    %97 = arith.select %89, %96, %94 : vector<128x128xi1>, vector<128x128xf32>
    %c0_41 = arith.constant 0 : index
    %c0_42 = arith.constant 0 : index
    %c0_43 = arith.constant 0 : index
    %98 = vector.load %arg15[%c0_41, %c0_42, %c0_43] : memref<1x128x128xf32, #tpu.memory_space<vmem>>, vector<1x128x128xf32>
    %99 = vector.shape_cast %98 : vector<1x128x128xf32> to vector<128x128xf32>
    %100 = vector.shape_cast %97 : vector<128x128xf32> to vector<1x128x128xf32>
    tpu.vector_store %arg15[%c0_41, %c0_42, %c0_43], %100 {strides = array<i32>} : memref<1x128x128xf32, #tpu.memory_space<vmem>>, vector<1x128x128xf32>,
    return
  }
  func.func @transform_0(%arg0: i32, %arg1: i32) -> (i32, i32) {
    %c0_i32 = arith.constant 0 : i32
    %c0_i32_0 = arith.constant 0 : i32
    return %arg0, %c0_i32 : i32, i32
  }
  func.func @transform_1(%arg0: i32, %arg1: i32) -> (i32, i32, i32) {
    %c0_i32 = arith.constant 0 : i32
    %c0_i32_0 = arith.constant 0 : i32
    %c0_i32_1 = arith.constant 0 : i32
    %c0_i32_2 = arith.constant 0 : i32
    return %c0_i32, %c0_i32_0, %c0_i32_1 : i32, i32, i32
  }
  func.func @transform_2(%arg0: i32, %arg1: i32) -> (i32, i32, i32) {
    %c0_i32 = arith.constant 0 : i32
    %c0_i32_0 = arith.constant 0 : i32
    %c0_i32_1 = arith.constant 0 : i32
    %c0_i32_2 = arith.constant 0 : i32
    return %c0_i32, %c0_i32_0, %c0_i32_1 : i32, i32, i32
  }
  func.func @transform_3(%arg0: i32, %arg1: i32) -> (i32, i32, i32) {
    %c0_i32 = arith.constant 0 : i32
    %c0_i32_0 = arith.constant 0 : i32
    %c0_i32_1 = arith.constant 0 : i32
    %c0_i32_2 = arith.constant 0 : i32
    return %c0_i32, %c0_i32_0, %c0_i32_1 : i32, i32, i32
  }
  func.func @transform_4(%arg0: i32, %arg1: i32) -> (i32, i32, i32) {
    %c0_i32 = arith.constant 0 : i32
    %c0_i32_0 = arith.constant 0 : i32
    %c0_i32_1 = arith.constant 0 : i32
    %c0_i32_2 = arith.constant 0 : i32
    return %c0_i32, %c0_i32_0, %c0_i32_1 : i32, i32, i32
  }
  func.func @transform_5(%arg0: i32, %arg1: i32) -> (i32, i32, i32) {
    %c0_i32 = arith.constant 0 : i32
    %c0_i32_0 = arith.constant 0 : i32
    %c0_i32_1 = arith.constant 0 : i32
    %c0_i32_2 = arith.constant 0 : i32
    return %c0_i32, %c0_i32_0, %c0_i32_1 : i32, i32, i32
  }
  func.func @transform_6(%arg0: i32, %arg1: i32) -> (i32, i32, i32) {
    %c0_i32 = arith.constant 0 : i32
    %c0_i32_0 = arith.constant 0 : i32
    %c0_i32_1 = arith.constant 0 : i32
    %c0_i32_2 = arith.constant 0 : i32
    return %c0_i32, %c0_i32_0, %c0_i32_1 : i32, i32, i32
  }
  func.func @transform_7(%arg0: i32, %arg1: i32) -> (i32, i32, i32) {
    %c0_i32 = arith.constant 0 : i32
    %c0_i32_0 = arith.constant 0 : i32
    %c0_i32_1 = arith.constant 0 : i32
    %c0_i32_2 = arith.constant 0 : i32
    return %c0_i32, %c0_i32_0, %c0_i32_1 : i32, i32, i32
  }
  func.func @transform_8(%arg0: i32, %arg1: i32) -> (i32, i32, i32) {
    %c0_i32 = arith.constant 0 : i32
    %c0_i32_0 = arith.constant 0 : i32
    %c0_i32_1 = arith.constant 0 : i32
    %c0_i32_2 = arith.constant 0 : i32
    return %c0_i32, %c0_i32_0, %c0_i32_1 : i32, i32, i32
  }
  func.func @transform_9(%arg0: i32, %arg1: i32) -> (i32, i32, i32) {
    %c0_i32 = arith.constant 0 : i32
    %c0_i32_0 = arith.constant 0 : i32
    %c0_i32_1 = arith.constant 0 : i32
    %c0_i32_2 = arith.constant 0 : i32
    return %c0_i32, %c0_i32_0, %c0_i32_1 : i32, i32, i32
  }
  func.func @transform_10(%arg0: i32, %arg1: i32) -> (i32, i32, i32) {
    %c0_i32 = arith.constant 0 : i32
    %c0_i32_0 = arith.constant 0 : i32
    %c0_i32_1 = arith.constant 0 : i32
    %c0_i32_2 = arith.constant 0 : i32
    return %c0_i32, %c0_i32_0, %c0_i32_1 : i32, i32, i32
  }
  func.func @transform_11(%arg0: i32, %arg1: i32) -> (i32, i32, i32) {
    %c0_i32 = arith.constant 0 : i32
    %c0_i32_0 = arith.constant 0 : i32
    %c0_i32_1 = arith.constant 0 : i32
    %c0_i32_2 = arith.constant 0 : i32
    return %c0_i32, %c0_i32_0, %c0_i32_1 : i32, i32, i32
  }
  func.func @transform_12(%arg0: i32, %arg1: i32) -> (i32, i32, i32) {
    %c0_i32 = arith.constant 0 : i32
    %c0_i32_0 = arith.constant 0 : i32
    %c0_i32_1 = arith.constant 0 : i32
    %c0_i32_2 = arith.constant 0 : i32
    return %c0_i32, %c0_i32_0, %c0_i32_1 : i32, i32, i32
  }
  func.func @transform_13(%arg0: i32, %arg1: i32) -> (i32, i32, i32) {
    %c0_i32 = arith.constant 0 : i32
    %c0_i32_0 = arith.constant 0 : i32
    return %arg1, %arg0, %c0_i32 : i32, i32, i32
  }
}

</mosaic_0001>

<bundles_post_ra>
// kernel: tpu_custom_call.1
= control target key start
LH: loop header
LB: loop body
LE: loop exit
PB: predicated region body
PF: predicated region fallthrough
CT: control target
= control target key end

     0   :  { %s3744_s0 = inlined_call_operand.vmem [shape: f32[128,12], index: 0, kind: input, shape index: {}]   ;;  %s3745_s1 = inlined_call_operand.vmem [shape: f32[4,1,12], index: 1, kind: input, shape index: {}]   ;;  %s3746_s2 = inlined_call_operand.vmem [shape: bf16[4,12,128], index: 2, kind: input, shape index: {}]   ;;  %s3747_s3 = inlined_call_operand.vmem [shape: f32[4,1,128], index: 3, kind: input, shape index: {}]   ;;  %s3748_s4 = inlined_call_operand.hbm [shape: bf16[4,128,128], index: 4, kind: input, shape index: {}]   ;;  %s3749_s5 = inlined_call_operand.vmem [shape: f32[4,1,128], index: 5, kind: input, shape index: {}]   ;;  %s3750_s6 = inlined_call_operand.hbm [shape: bf16[4,128,128], index: 6, kind: input, shape index: {}]   ;;  %s3751_s7 = inlined_call_operand.vmem [shape: f32[4,1,128], index: 7, kind: input, shape index: {}]   ;;  %s3752_s8 = inlined_call_operand.vmem [shape: f32[4,1,128], index: 8, kind: input, shape index: {}]   ;;  %s3753_s9 = inlined_call_operand.vmem [shape: f32[4,1,128], index: 9, kind: input, shape index: {}]   ;;  %s3754_s10 = inlined_call_operand.hbm [shape: bf16[4,128,128], index: 10, kind: input, shape index: {}]   ;;  %s3755_s11 = inlined_call_operand.hbm [shape: bf16[4,128,128], index: 11, kind: input, shape index: {}]   ;;  %s3756_s12 = inlined_call_operand.hbm [shape: bf16[4,128,128], index: 12, kind: input, shape index: {}]   ;;  %s3757_s13 = inlined_call_operand.hbm [shape: f32[4,128,128], index: 13, kind: output, shape index: {}]  }
   0x1   :  { %3765 = sst [smem:[#allocation23_spill]] %s3750_s6 }
   0x2   :  { %18 = vsyncpa [#allocation3], 0 }
   0x3   :  { %19 = vsyncpa [#allocation6], 0 }
   0x4   :  { %20 = vsyncpa [#allocation9], 0 }
   0x5   :  { %21 = vsyncpa [#allocation4], 0 }
   0x6   :  { %23 = vsyncpa [#allocation4 + $0x1], 0  ;;  %s3002_s25 = smov 0   ;;  %s3004_s26 = smov 0  }
   0x7   :  { %s3006_s27 = smov 0   ;;  %s3008_s28 = smov 0  }
   0x8   :  { %s3010_s29 = smov 0   ;;  %s3012_s30 = smov 0  }
   0x9 LB: > { %3766 = sst [smem:[#allocation16_spill]] %s2899_s25  ;;  %s2142_s14 = sadd.s32 4294967295, %s2919_s30   ;;  %s2919_s30 = sphi %s3012_s30, %s29_s30   ;;  %s2915_s29 = sphi %s3010_s29, %s3787_s29   ;;  %s2911_s28 = sphi %s3008_s28, %s3786_s28   ;;  %s2907_s27 = sphi %s3006_s27, %s3785_s27   ;;  %s2903_s26 = sphi %s3004_s26, %s3789_s26   ;;  %s2899_s25 = sphi %s3002_s25, %s3788_s25  }
   0xa   : > { %3767 = sst [smem:[#allocation17_spill]] %s2907_s27  ;;  %s2143_s15 = sadd.s32 4294967294, %s2919_s30  }
   0xb   : > { %3768 = sst [smem:[#allocation18_spill]] %s2915_s29  ;;  %s38_s16 = sadd.s32 1, %s2915_s29 }
   0xc   : > { %3769 = sst [smem:[#allocation19_spill]] %s2919_s30  ;;  %s328_s17 = sadd.s32 1, %s2907_s27 }
   0xd   : > { %p39_p0 = scmp.ge.s32.totalorder %s38_s16, 4  ;;  %p338_p1 = scmp.ne.s32.totalorder %s2907_s27, %s2903_s26 }
   0xe   : > { %p339_p2 = scmp.eq.s32.totalorder %s2142_s14, 3  ;;  %p344_p3 = scmp.ne.s32.totalorder %s2903_s26, %s2899_s25 }
   0xf   : > { %s3791_s16 = smov (%p39_p0, %s38_s16), 0  ;;  %p345_p5 = scmp.eq.s32.totalorder %s2143_s15, 3 }
  0x10   : > { %3770 = sst [smem:[#allocation20_spill]] %s3791_s16  ;;  %p3042_p4 = por %p339_p2, %p338_p1 }
  0x11   : > { %s323_s19 = ssub.s32 %s2915_s29, %s3791_s16  ;;  %p2144_p6 = scmp.ge.s32.totalorder %s2919_s30, 1 }
  0x12   : > { %p326_p7 = scmp.eq.s32.totalorder %s323_s19, 0  ;;  %p3049_p8 = por %p345_p5, %p344_p3 }
  0x13   : > { %p352_p9 = scmp.lt.s32.totalorder %s2919_s30, 5  ;;  %p3061_p11 = scmp.eq.s32.totalorder %s2142_s14, 0 }
  0x14   : > { %s3772_s20 = scalar_select %p3049_p8, 1, 0 }
  0x15   : > { %s3055_s21 = scalar_select %p326_p7, %s2907_s27, %s328_s17  }
  0x16   : > { %3773 = sst [smem:[#allocation21_spill]] %s3772_s20  ;;  %p3057_p10 = pnand %p2144_p6, %p352_p9 }
  0x17   : > { %3774 = sst [smem:[#allocation22_spill]] %s3055_s21  ;;  %s2921_s24 = smov [#allocation5]  }
  0x18   : > { %p2539_p12 = pneg %p3057_p10  ;;  %s398_s15 = sshll.u32 %s2921_s24, 4  ;;  %s399_s15 = int_to_ptr.vmem [resolvable:$true] %s398_s15 }
  0x19   : > { %s2922_s17 = smov [#allocation8]   ;;  %s2712_s29 = scalar_lea.vmem %s399_s15, 4096 }
  0x1a   : > { %p3069_p13 = pnand %p3061_p11, %p2539_p12  ;;  %s433_s16 = sshll.u32 %s2922_s17, 4  ;;  %s434_s16 = int_to_ptr.vmem [resolvable:$true] %s433_s16 }
  0x1b   : > { %p2713_p1 = scmp.ne.s32.totalorder %s399_s15, %s2712_s29  ;;  %p2720_p5 = scmp.lt.s32.totalorder %s399_s15, %s399_s15 }
  0x1c   : > { %p3075_p0 = pneg %p3069_p13  ;;  %p2721_p6 = scmp.lt.s32.totalorder %s2712_s29, %s2712_s29 }
  0x1e   : > { %p2715_p2 = pnand %p2713_p1, %p3075_p0  ;;  %p2722_p7 = por %p2721_p6, %p2720_p5 }
  0x20   : > { %p2716_p3 = pneg %p2715_p2 }
  0x22   : > { %p2723_p9 = pnand %p2722_p7, %p2716_p3 }
  0x24   : > { %2726 = shalt.err (!%p2723_p9)
}
  0x25   : > { %s2923_s24 = smov 64   ;;  %s2924_s17 = smov 4  }
  0x26   : > { %s3779_s6 = sld [smem:[#allocation23_spill]]  ;;  %s2738_s20 = scalar_lea.vmem %s434_s16, 4096 }
  0x27   : > { %p2739_p12 = scmp.ne.s32.totalorder %s434_s16, %s2738_s20  ;;  %p2746_p5 = scmp.lt.s32.totalorder %s434_s16, %s434_s16 }
  0x28   : > { %p2747_p3 = scmp.lt.s32.totalorder %s2738_s20, %s2738_s20 }
  0x29   : > { %p2741_p1 = pnand %p2739_p12, %p3075_p0 }
  0x2a   : > { %p2748_p6 = por %p2747_p3, %p2746_p5 }
  0x2b   : > { %p2742_p2 = pneg %p2741_p1 }
  0x2c   : > { %2545 = dma.hbm_to_vmem [thread:$0]  (!%p3069_p13), %s3779_s6, 4096, %s399_s15, [#allocation6], %s2923_s24, %s2923_s24, %s2924_s17  }
  0x2d   : > { %p2749_p7 = pnand %p2748_p6, %p2742_p2 }
  0x2f   : > { %2752 = shalt.err (!%p2749_p7)
}
  0x30   : > { %2551 = dma.hbm_to_vmem [thread:$0]  (!%p3069_p13), %s3755_s11, 4096, %s434_s16, [#allocation9], %s2923_s24, %s2923_s24, %s2924_s17  }
  0x31   : > { %s2925_s27 = smov [#allocation2]   ;;  %s2926_s15 = smov [#allocation7]  }
  0x32   : > { %s382_s21 = sshll.u32 %s2925_s27, 4  ;;  %s420_s6 = sshll.u32 %s2926_s15, 4  ;;  %s383_s21 = int_to_ptr.vmem [resolvable:$true] %s382_s21  ;;  %s421_s6 = int_to_ptr.vmem [resolvable:$true] %s420_s6 }
  0x33   : > { %s2764_s30 = scalar_lea.vmem %s383_s21, 4096  ;;  %p2772_p2 = scmp.lt.s32.totalorder %s383_s21, %s383_s21 }
  0x34   : > { %p2765_p9 = scmp.ne.s32.totalorder %s383_s21, %s2764_s30  ;;  %p2773_p5 = scmp.lt.s32.totalorder %s2764_s30, %s2764_s30 }
  0x36   : > { %p2767_p12 = pnand %p2765_p9, %p3075_p0  ;;  %p2774_p3 = por %p2773_p5, %p2772_p2 }
  0x38   : > { %p2768_p1 = pneg %p2767_p12 }
  0x3a   : > { %p2775_p6 = pnand %p2774_p3, %p2768_p1 }
  0x3c   : > { %2778 = shalt.err (!%p2775_p6)
}
  0x3d   : > { %2542 = dma.hbm_to_vmem [thread:$0]  (!%p3069_p13), %s3748_s4, 4096, %s383_s21, [#allocation3], %s2923_s24, %s2923_s24, %s2924_s17  }
  0x3e   : > { %s2790_s20 = scalar_lea.vmem %s421_s6, 4096  ;;  %p2798_p8 = scmp.lt.s32.totalorder %s421_s6, %s421_s6 }
  0x3f   : > { %p2791_p7 = scmp.ne.s32.totalorder %s421_s6, %s2790_s20  ;;  %p2799_p2 = scmp.lt.s32.totalorder %s2790_s20, %s2790_s20 }
  0x41   : > { %p2793_p9 = pnand %p2791_p7, %p3075_p0  ;;  %p2800_p1 = por %p2799_p2, %p2798_p8 }
  0x43   : > { %p2794_p12 = pneg %p2793_p9 }
  0x45   : > { %p2801_p5 = pnand %p2800_p1, %p2794_p12 }
  0x47   : > { %2804 = shalt.err (!%p2801_p5)
}
  0x48   : > { %2548 = dma.hbm_to_vmem [thread:$0]  (!%p3069_p13), %s3754_s10, 4096, %s421_s6, [#allocation6], %s2923_s24, %s2923_s24, %s2924_s17  }
  0x49   : > { %s2927_s27 = smov [#allocation10]  }
  0x4a   : > { %s446_s21 = sshll.u32 %s2927_s27, 4  ;;  %s447_s21 = int_to_ptr.vmem [resolvable:$true] %s446_s21 }
  0x4b   : > { %s2816_s15 = scalar_lea.vmem %s447_s21, 4096  ;;  %p2824_p7 = scmp.lt.s32.totalorder %s447_s21, %s447_s21 }
  0x4c   : > { %p2817_p3 = scmp.ne.s32.totalorder %s447_s21, %s2816_s15  ;;  %p2825_p9 = scmp.lt.s32.totalorder %s2816_s15, %s2816_s15 }
  0x4e   : > { %p2819_p6 = pnand %p2817_p3, %p3075_p0  ;;  %p2826_p12 = por %p2825_p9, %p2824_p7 }
  0x50   : > { %p2820_p8 = pneg %p2819_p6 }
  0x52   : > { %p2827_p2 = pnand %p2826_p12, %p2820_p8 }
  0x54   : > { %2830 = shalt.err (!%p2827_p2)
}
  0x55   : > { %2554 = dma.hbm_to_vmem [thread:$0]  (!%p3069_p13), %s3756_s12, 4096, %s447_s21, [#allocation9], %s2923_s24, %s2923_s24, %s2924_s17  }
  0x56   : > { %462 = sbr.rel (%p3057_p10) target bundleno = 1375 (0x55f), region = 72 }
  0x5b   : > { %2882 = dma.done.wait (%p3061_p11), [#allocation3], 4096  }
  0x5c   : > { %2884 = vsyncadd (%p3061_p11), [#allocation3], 4294963200 }
  0x5d   : > { %2886 = dma.done.wait (%p3061_p11), [#allocation6], 8192  }
  0x5e   : > { %2888 = vsyncadd (%p3061_p11), [#allocation6], 4294959104 }
  0x5f   : > { %2890 = dma.done.wait (%p3061_p11), [#allocation9], 8192  }
  0x60   : > { %2892 = vsyncadd (%p3061_p11), [#allocation9], 4294959104  ;;  %s2226_s22 = sshll.u32 %s2911_s28, 3  ;;  %s546_s20 = scalar_lea.vmem %s3745_s1, %s2911_s28  ;;  %vm621_vm0 = vcmask 1045504   ;;  %v530_v1 = vld [vmem:[%s3744_s0] sm:$0xff]  ;;  %v531_v2 = vld [vmem:[%s3744_s0 + $0x8] sm:$0xff] }
  0x61   : > { %s580_s24 = scalar_lea.vmem %s3746_s2, %s2226_s22  ;;  %v2158_v3 = vld [vmem:[%s546_s20] ss:$0 sm:$0xff]  ;;  %s3158_s21 = sshll.u32 %s2911_s28, 6  ;;  %v532_v7 = vld [vmem:[%s3744_s0 + $0x10] sm:$0xff]  ;;  %v533_v8 = vld [vmem:[%s3744_s0 + $0x18] sm:$0xff]  ;;  %vm596_vm1 = vcmask 97280  }
  0x62   : > { %v2628_v0 = vld [vmem:[%s580_s24] sm:$0x3f]   ;;  %v554_v5 = vmul.f32 %v2158_v3, %v530_v1  ;;  %v555_v6 = vmul.f32 %v2158_v3, %v531_v2  ;;  %v556_v10 = vmul.f32 %v2158_v3, %v532_v7  ;;  %v557_v11 = vmul.f32 %v2158_v3, %v533_v8  ;;  %v535_v12 = vld [vmem:[%s3744_s0 + $0x28] sm:$0xff]  ;;  %v536_v16 = vld [vmem:[%s3744_s0 + $0x30] sm:$0xff]  ;;  %s3186_s6 = scalar_lea.vmem [#allocation2], %s3158_s21  ;;  %s3222_s25 = scalar_lea.vmem [#allocation5], %s3158_s21 }
  0x63   : > { %2516 = vmatprep.subr.msk.bf16.mxu0 %vm621_vm0, %v2628_v0  ;;  %v623_v4 = vsel %vm621_vm0, %v2628_v0, 0  ;;  %v534_v9 = vld [vmem:[%s3744_s0 + $0x20] sm:$0xff]  ;;  %v559_v15 = vmul.f32 %v2158_v3, %v535_v12  ;;  %v537_v17 = vld [vmem:[%s3744_s0 + $0x38] sm:$0xff]  ;;  %v539_v20 = vld [vmem:[%s3744_s0 + $0x48] sm:$0xff]  ;;  %v560_v22 = vmul.f32 %v2158_v3, %v536_v16  ;;  %s583_s19 = scalar_lea.vmem %s3747_s3, %s2911_s28  ;;  %v2928_v1 = vmov 0.2   ;;  %s797_s16 = scalar_lea.vmem %s3749_s5, %s2911_s28 }
  0x64   : > { %2323 = vmatpush3.bf16.msra.mxu0 %v623_v4  ;;  %v558_v13 = vmul.f32 %v2158_v3, %v534_v9  ;;  %v570_v14 = vpack.c.bf16 %v555_v6, %v554_v5  ;;  %v571_v18 = vpack.c.bf16 %v557_v11, %v556_v10  ;;  %v538_v19 = vld [vmem:[%s3744_s0 + $0x40] sm:$0xff]  ;;  %v561_v23 = vmul.f32 %v2158_v3, %v537_v17  ;;  %v2629_v24 = vld [vmem:[%s3186_s6 + $0x38] sm:$0xff]   ;;  %v2630_v27 = vld [vmem:[%s3186_s6 + $0x30] sm:$0xff]   ;;  %s3319_s14 = scalar_lea.vmem [#allocation8], %s3158_s21  ;;  %s1024_s29 = scalar_lea.vmem %s3751_s7, %s2911_s28 }
  0x65   : > { %v562_v25 = vmul.f32 %v2158_v3, %v538_v19  ;;  %v563_v26 = vmul.f32 %v2158_v3, %v539_v20  ;;  %2340 = vmatprep.subr.bf16.mxu1 %v2629_v24  ;;  %v540_v28 = vld [vmem:[%s3744_s0 + $0x50] sm:$0xff]  ;;  %v541_v29 = vld [vmem:[%s3744_s0 + $0x58] sm:$0xff]  ;;  %v2631_v30 = vld [vmem:[%s3186_s6 + $0x28] sm:$0xff]   ;;  %s1209_s15 = scalar_lea.vmem %s3752_s8, %s2911_s28 }
  0x66   : > { %2324 = vmatprep.mubr.msk.bf16.mxu0 %vm596_vm1, %v570_v14  ;;  %v572_v21 = vpack.c.bf16 %v559_v15, %v558_v13  ;;  %2341 = vmatpush3.bf16.msra.mxu1 %v2629_v24  ;;  %v573_v31 = vpack.c.bf16 %v561_v23, %v560_v22  ;;  %v542_v33 = vld [vmem:[%s3744_s0 + $0x60] sm:$0xff]  ;;  %v543_v34 = vld [vmem:[%s3744_s0 + $0x68] sm:$0xff]  ;;  %v564_v35 = vmul.f32 %v2158_v3, %v540_v28  ;;  %v544_v42 = vld [vmem:[%s3744_s0 + $0x70] sm:$0xff] }
  0x67   : > { %2325 = vmatmul.mubr.msk.bf16.vlgmr.msra.gmra.mxu0 %vm596_vm1, %v571_v18  ;;  %2342 = vmatprep.subr.bf16.mxu1 %v2630_v27  ;;  %v574_v32 = vpack.c.bf16 %v563_v26, %v562_v25  ;;  %v565_v36 = vmul.f32 %v2158_v3, %v541_v29  ;;  %v2632_v37 = vld [vmem:[%s3186_s6 + $0x20] sm:$0xff]   ;;  %v566_v38 = vmul.f32 %v2158_v3, %v542_v33  ;;  %v545_v43 = vld [vmem:[%s3744_s0 + $0x78] sm:$0xff]  ;;  %v2634_v48 = vld [vmem:[%s3186_s6 + $0x10] sm:$0xff]  }
  0x68   : > { %2328 = vmatprep.mubr.msk.bf16.mxu0 %vm596_vm1, %v572_v21  ;;  %v567_v39 = vmul.f32 %v2158_v3, %v543_v34  ;;  %v568_v44 = vmul.f32 %v2158_v3, %v544_v42  ;;  %v569_v45 = vmul.f32 %v2158_v3, %v545_v43  ;;  %v2633_v47 = vld [vmem:[%s3186_s6 + $0x18] sm:$0xff]   ;;  %v2635_v49 = vld [vmem:[%s3186_s6 + $0x8] sm:$0xff]   ;;  %v2636_v50 = vld [vmem:[%s3186_s6] sm:$0xff]   ;;  %s3507_s6 = scalar_lea.vmem [#allocation10], %s3158_s21 }
  0x69   : > { %v575_v40 = vpack.c.bf16 %v565_v36, %v564_v35  ;;  %v2637_v51 = vld [vmem:[%s3222_s25 + $0x38] sm:$0xff]   ;;  %v2638_v52 = vld [vmem:[%s3222_s25 + $0x30] sm:$0xff]   ;;  %v2639_v53 = vld [vmem:[%s3222_s25 + $0x28] sm:$0xff]  }
  0x6a   : > { %2343 = vmatpush3.bf16.msra.mxu1 %v2630_v27  ;;  %v576_v41 = vpack.c.bf16 %v567_v39, %v566_v38  ;;  %v577_v46 = vpack.c.bf16 %v569_v45, %v568_v44  ;;  %2372 = vmatprep.subr.bf16.mxu0 %v2637_v51  ;;  %v2640_v54 = vld [vmem:[%s3222_s25 + $0x20] sm:$0xff]   ;;  %v2641_v55 = vld [vmem:[%s3222_s25 + $0x18] sm:$0xff]  }
  0x6b   : > { %2344 = vmatprep.subr.bf16.mxu1 %v2631_v30  ;;  %2373 = vmatpush3.bf16.msra.mxu0 %v2637_v51  ;;  %v3233_v56 = vld [vmem:[%s583_s19] ss:$0 sm:$0xff]  ;;  %s1826_s19 = scalar_lea.vmem %s3753_s9, %s2911_s28 }
  0x6c   : > { %2374 = vmatprep.subr.bf16.mxu0 %v2638_v52 }
  0x6e   : > { %2345 = vmatpush3.bf16.msra.mxu1 %v2631_v30 }
  0x6f   : > { %2329 = vmatmul.mubr.msk.bf16.gmra.mxu0 %vm596_vm1, %v573_v31  ;;  %2346 = vmatprep.subr.bf16.mxu1 %v2632_v37 }
  0x70   : > { %2332 = vmatprep.mubr.msk.bf16.mxu0 %vm596_vm1, %v574_v32  ;;  %2375 = vmatpush3.bf16.msra.mxu0 %v2638_v52 }
  0x71   : > { %2376 = vmatprep.subr.bf16.mxu0 %v2639_v53 }
  0x72   : > { %2347 = vmatpush3.bf16.msra.mxu1 %v2632_v37 }
  0x73   : > { %2348 = vmatprep.subr.bf16.mxu1 %v2633_v47 }
  0x74   : > { %2377 = vmatpush3.bf16.msra.mxu0 %v2639_v53 }
  0x75   : > { %2378 = vmatprep.subr.bf16.mxu0 %v2640_v54 }
  0x76   : > { %2349 = vmatpush3.bf16.msra.mxu1 %v2633_v47 }
  0x77   : > { %2333 = vmatmul.mubr.msk.bf16.gmra.mxu0 %vm596_vm1, %v575_v40  ;;  %2350 = vmatprep.subr.bf16.mxu1 %v2634_v48 }
  0x78   : > { %2336 = vmatprep.mubr.msk.bf16.mxu0 %vm596_vm1, %v576_v41  ;;  %2379 = vmatpush3.bf16.msra.mxu0 %v2640_v54 }
  0x79   : > { %2380 = vmatprep.subr.bf16.mxu0 %v2641_v55 }
  0x7a   : > { %2351 = vmatpush3.bf16.msra.mxu1 %v2634_v48 }
  0x7b   : > { %2352 = vmatprep.subr.bf16.mxu1 %v2635_v49 }
  0x7c   : > { %2381 = vmatpush3.bf16.msra.mxu0 %v2641_v55 }
  0x7e   : > { %2353 = vmatpush3.bf16.msra.mxu1 %v2635_v49 }
  0x7f   : > { %2337 = vmatmul.mubr.msk.bf16.gmra.mxu0 %vm596_vm1, %v577_v46  ;;  %2354 = vmatprep.subr.bf16.mxu1 %v2636_v50 }
  0x82   : > { %2355 = vmatpush3.bf16.msra.mxu1 %v2636_v50 }
 0x127   : > { %v2326_v57 = vpop.f32.mrf.mxu0 }
 0x128   : > { %v668_v58 = vadd.f32 %v2326_v57, %v3233_v56 }
 0x129   : > { %v659_v59 = vpop.f32.mrf.mxu0 }
 0x12a   : > { %v660_v60 = vadd.f32 %v3233_v56, %v659_v59  ;;  %vm724_vm3 = vcmp.gt.f32.partialorder %v668_v58, 0.0 }
 0x12b   : > { %v2327_v61 = vpop.f32.mrf.mxu0  ;;  %v3246_v5 = vsel %vm724_vm3, 1.0, %v2928_v1 }
 0x12c   : > { %vm722_vm2 = vcmp.gt.f32.partialorder %v660_v60, 0.0  ;;  %v671_v62 = vadd.f32 %v2327_v61, %v3233_v56  ;;  %v756_v13 = vmul.f32 %v3246_v5, %v668_v58 }
 0x12d   : > { %v662_v63 = vpop.f32.mrf.mxu0  ;;  %v3243_v4 = vsel %vm722_vm2, 1.0, %v2928_v1 }
 0x12e   : > { %vm725_vm4 = vcmp.gt.f32.partialorder %v671_v62, 0.0  ;;  %v663_v0 = vadd.f32 %v3233_v56, %v662_v63  ;;  %v754_v11 = vmul.f32 %v3243_v4, %v660_v60 }
 0x12f   : > { %v3240_v2 = vsel %vm725_vm4, 1.0, %v2928_v1  ;;  %v2330_v3 = vpop.f32.mrf.mxu0 }
 0x130   : > { %vm723_vm5 = vcmp.gt.f32.partialorder %v663_v0, 0.0  ;;  %v757_v6 = vmul.f32 %v3240_v2, %v671_v62  ;;  %v684_v7 = vadd.f32 %v2330_v3, %v3233_v56 }
 0x131   : > { %v675_v8 = vpop.f32.mrf.mxu0  ;;  %v3251_v9 = vsel %vm723_vm5, 1.0, %v2928_v1 }
 0x132   : > { %v676_v10 = vadd.f32 %v3233_v56, %v675_v8  ;;  %v755_v12 = vmul.f32 %v3251_v9, %v663_v0  ;;  %vm728_vm7 = vcmp.gt.f32.partialorder %v684_v7, 0.0  ;;  %v771_v18 = vpack.c.bf16 %v757_v6, %v756_v13  ;;  %v2642_v6 = vld [vmem:[%s3222_s25 + $0x10] sm:$0xff]   ;;  %v2644_v8 = vld [vmem:[%s3222_s25] sm:$0xff]  }
 0x133   : > { %v2331_v14 = vpop.f32.mrf.mxu0  ;;  %v3266_v23 = vsel %vm728_vm7, 1.0, %v2928_v1  ;;  %2382 = vmatprep.subr.bf16.mxu0 %v2642_v6  ;;  %v2648_v13 = vld [vmem:[%s3319_s14 + $0x20] sm:$0xff]  }
 0x134   : > { %vm726_vm6 = vcmp.gt.f32.partialorder %v676_v10, 0.0  ;;  %v687_v15 = vadd.f32 %v2331_v14, %v3233_v56  ;;  %v770_v16 = vpack.c.bf16 %v755_v12, %v754_v11  ;;  %v760_v31 = vmul.f32 %v3266_v23, %v684_v7  ;;  %2383 = vmatpush3.bf16.msra.mxu0 %v2642_v6  ;;  %v2643_v7 = vld [vmem:[%s3222_s25 + $0x8] sm:$0xff]   ;;  %v2646_v11 = vld [vmem:[%s3319_s14 + $0x30] sm:$0xff]   ;;  %v2649_v14 = vld [vmem:[%s3319_s14 + $0x18] sm:$0xff]   ;;  %s3488_s25 = scalar_lea.vmem [#allocation7], %s3158_s21 }
 0x135   : > { %v678_v17 = vpop.f32.mrf.mxu0  ;;  %v3260_v20 = vsel %vm726_vm6, 1.0, %v2928_v1  ;;  %2384 = vmatprep.subr.bf16.mxu0 %v2643_v7  ;;  %v2647_v12 = vld [vmem:[%s3319_s14 + $0x28] sm:$0xff]  }
 0x136   : > { %vm729_vm8 = vcmp.gt.f32.partialorder %v687_v15, 0.0  ;;  %v679_v19 = vadd.f32 %v3233_v56, %v678_v17  ;;  %2356 = vmatprep.mubr.bf16.mxu1 %v770_v16  ;;  %v758_v28 = vmul.f32 %v3260_v20, %v676_v10  ;;  %v2645_v10 = vld [vmem:[%s3319_s14 + $0x38] sm:$0xff]  }
 0x137   : > { %v3263_v21 = vsel %vm729_vm8, 1.0, %v2928_v1  ;;  %v2334_v22 = vpop.f32.mrf.mxu0  ;;  %2357 = vmatmul.mubr.bf16.vlgmr.msra.gmra.mxu1 %v771_v18  ;;  %2404 = vmatprep.subr.bf16.mxu1 %v2645_v10 }
 0x138   : > { %vm727_vm9 = vcmp.gt.f32.partialorder %v679_v19, 0.0  ;;  %v761_v24 = vmul.f32 %v3263_v21, %v687_v15  ;;  %v700_v26 = vadd.f32 %v2334_v22, %v3233_v56  ;;  %2385 = vmatpush3.bf16.msra.mxu0 %v2643_v7  ;;  %2405 = vmatpush3.bf16.msra.mxu1 %v2645_v10  ;;  %v3330_v15 = vld [vmem:[%s797_s16] ss:$0 sm:$0xff]  ;;  %s2232_s16 = sshll.u32 %s2911_s28, 11 }
 0x139   : > { %v3270_v25 = vsel %vm727_vm9, 1.0, %v2928_v1  ;;  %v691_v27 = vpop.f32.mrf.mxu0  ;;  %2386 = vmatprep.subr.bf16.mxu0 %v2644_v8  ;;  %2406 = vmatprep.subr.bf16.mxu1 %v2646_v11  ;;  %s3687_s28 = scalar_lea.hbm %s3757_s13, %s2232_s16 }
 0x13a   : > { %v759_v29 = vmul.f32 %v3270_v25, %v679_v19  ;;  %v692_v30 = vadd.f32 %v3233_v56, %v691_v27  ;;  %vm732_vm11 = vcmp.gt.f32.partialorder %v700_v26, 0.0  ;;  %v773_v36 = vpack.c.bf16 %v761_v24, %v760_v31 }
 0x13b   : > { %v2335_v32 = vpop.f32.mrf.mxu0  ;;  %v3286_v41 = vsel %vm732_vm11, 1.0, %v2928_v1 }
 0x13c   : > { %vm730_vm10 = vcmp.gt.f32.partialorder %v692_v30, 0.0  ;;  %v703_v33 = vadd.f32 %v2335_v32, %v3233_v56  ;;  %v772_v34 = vpack.c.bf16 %v759_v29, %v758_v28  ;;  %v764_v49 = vmul.f32 %v3286_v41, %v700_v26  ;;  %2387 = vmatpush3.bf16.msra.mxu0 %v2644_v8  ;;  %2407 = vmatpush3.bf16.msra.mxu1 %v2646_v11 }
 0x13d   : > { %v694_v35 = vpop.f32.mrf.mxu0  ;;  %v3280_v38 = vsel %vm730_vm10, 1.0, %v2928_v1  ;;  %2408 = vmatprep.subr.bf16.mxu1 %v2647_v12 }
 0x13e   : > { %vm733_vm12 = vcmp.gt.f32.partialorder %v703_v33, 0.0  ;;  %v695_v37 = vadd.f32 %v3233_v56, %v694_v35  ;;  %2360 = vmatprep.mubr.bf16.mxu1 %v772_v34  ;;  %v762_v46 = vmul.f32 %v3280_v38, %v692_v30 }
 0x13f   : > { %v3283_v39 = vsel %vm733_vm12, 1.0, %v2928_v1  ;;  %v2338_v40 = vpop.f32.mrf.mxu0  ;;  %2361 = vmatmul.mubr.bf16.gmra.mxu1 %v773_v36 }
 0x140   : > { %vm731_vm13 = vcmp.gt.f32.partialorder %v695_v37, 0.0  ;;  %v765_v42 = vmul.f32 %v3283_v39, %v703_v33  ;;  %v716_v44 = vadd.f32 %v2338_v40, %v3233_v56  ;;  %2409 = vmatpush3.bf16.msra.mxu1 %v2647_v12 }
 0x141   : > { %v3290_v43 = vsel %vm731_vm13, 1.0, %v2928_v1  ;;  %v707_v45 = vpop.f32.mrf.mxu0  ;;  %2410 = vmatprep.subr.bf16.mxu1 %v2648_v13 }
 0x142   : > { %v763_v47 = vmul.f32 %v3290_v43, %v695_v37  ;;  %v708_v48 = vadd.f32 %v3233_v56, %v707_v45  ;;  %vm736_vm15 = vcmp.gt.f32.partialorder %v716_v44, 0.0  ;;  %v775_v54 = vpack.c.bf16 %v765_v42, %v764_v49 }
 0x143   : > { %v2339_v50 = vpop.f32.mrf.mxu0  ;;  %v3306_v59 = vsel %vm736_vm15, 1.0, %v2928_v1 }
 0x144   : > { %vm734_vm14 = vcmp.gt.f32.partialorder %v708_v48, 0.0  ;;  %v719_v51 = vadd.f32 %v2339_v50, %v3233_v56  ;;  %v774_v52 = vpack.c.bf16 %v763_v47, %v762_v46  ;;  %v768_v63 = vmul.f32 %v3306_v59, %v716_v44  ;;  %2411 = vmatpush3.bf16.msra.mxu1 %v2648_v13 }
 0x145   : > { %v710_v53 = vpop.f32.mrf.mxu0  ;;  %v3300_v57 = vsel %vm734_vm14, 1.0, %v2928_v1  ;;  %2412 = vmatprep.subr.bf16.mxu1 %v2649_v14 }
 0x146   : > { %vm737_vm0 = vcmp.gt.f32.partialorder %v719_v51, 0.0  ;;  %v711_v55 = vadd.f32 %v3233_v56, %v710_v53  ;;  %2364 = vmatprep.mubr.bf16.mxu1 %v774_v52  ;;  %v766_v56 = vmul.f32 %v3300_v57, %v708_v48 }
 0x147   : > { %v3303_v58 = vsel %vm737_vm0, 1.0, %v2928_v1  ;;  %2365 = vmatmul.mubr.bf16.gmra.mxu1 %v775_v54 }
 0x148   : > { %vm735_vm1 = vcmp.gt.f32.partialorder %v711_v55, 0.0  ;;  %v769_v60 = vmul.f32 %v3303_v58, %v719_v51  ;;  %2413 = vmatpush3.bf16.msra.mxu1 %v2649_v14 }
 0x149   : > { %v3310_v61 = vsel %vm735_vm1, 1.0, %v2928_v1 }
 0x14a   : > { %v767_v62 = vmul.f32 %v3310_v61, %v711_v55  ;;  %v777_v3 = vpack.c.bf16 %v769_v60, %v768_v63 }
 0x14c   : > { %v776_v0 = vpack.c.bf16 %v767_v62, %v766_v56 }
 0x14e   : > { %2368 = vmatprep.mubr.bf16.mxu1 %v776_v0 }
 0x14f   : > { %2369 = vmatmul.mubr.bf16.gmra.mxu1 %v777_v3 }
 0x1f7   : > { %v2358_v16 = vpop.f32.mrf.mxu1 }
 0x1f8   : > { %v896_v17 = vadd.f32 %v2358_v16, %v3330_v15 }
 0x1f9   : > { %v887_v18 = vpop.f32.mrf.mxu1 }
 0x1fa   : > { %v888_v19 = vadd.f32 %v3330_v15, %v887_v18  ;;  %vm952_vm3 = vcmp.gt.f32.partialorder %v896_v17, 0.0 }
 0x1fb   : > { %v2359_v22 = vpop.f32.mrf.mxu1  ;;  %v3343_v31 = vsel %vm952_vm3, 1.0, %v2928_v1 }
 0x1fc   : > { %vm950_vm2 = vcmp.gt.f32.partialorder %v888_v19, 0.0  ;;  %v899_v24 = vadd.f32 %v2359_v22, %v3330_v15  ;;  %v984_v42 = vmul.f32 %v3343_v31, %v896_v17 }
 0x1fd   : > { %v890_v26 = vpop.f32.mrf.mxu1  ;;  %v3337_v28 = vsel %vm950_vm2, 1.0, %v2928_v1 }
 0x1fe   : > { %vm953_vm4 = vcmp.gt.f32.partialorder %v899_v24, 0.0  ;;  %v891_v27 = vadd.f32 %v3330_v15, %v890_v26  ;;  %v982_v36 = vmul.f32 %v3337_v28, %v888_v19 }
 0x1ff   : > { %v3340_v29 = vsel %vm953_vm4, 1.0, %v2928_v1  ;;  %v2362_v30 = vpop.f32.mrf.mxu1 }
 0x200   : > { %vm951_vm5 = vcmp.gt.f32.partialorder %v891_v27, 0.0  ;;  %v985_v32 = vmul.f32 %v3340_v29, %v899_v24  ;;  %v912_v34 = vadd.f32 %v2362_v30, %v3330_v15 }
 0x201   : > { %v3347_v33 = vsel %vm951_vm5, 1.0, %v2928_v1  ;;  %v903_v35 = vpop.f32.mrf.mxu1 }
 0x202   : > { %v983_v37 = vmul.f32 %v3347_v33, %v891_v27  ;;  %v904_v40 = vadd.f32 %v3330_v15, %v903_v35  ;;  %v999_v47 = vpack.c.bf16 %v985_v32, %v984_v42  ;;  %vm956_vm7 = vcmp.gt.f32.partialorder %v912_v34, 0.0 }
 0x203   : > { %v2363_v44 = vpop.f32.mrf.mxu1  ;;  %v3363_v53 = vsel %vm956_vm7, 1.0, %v2928_v1 }
 0x204   : > { %vm954_vm6 = vcmp.gt.f32.partialorder %v904_v40, 0.0  ;;  %v915_v45 = vadd.f32 %v2363_v44, %v3330_v15  ;;  %v998_v46 = vpack.c.bf16 %v983_v37, %v982_v36  ;;  %v988_v3 = vmul.f32 %v3363_v53, %v912_v34 }
 0x205   : > { %v906_v48 = vpop.f32.mrf.mxu1  ;;  %v3357_v50 = vsel %vm954_vm6, 1.0, %v2928_v1 }
 0x206   : > { %vm957_vm8 = vcmp.gt.f32.partialorder %v915_v45, 0.0  ;;  %v907_v49 = vadd.f32 %v3330_v15, %v906_v48  ;;  %2388 = vmatprep.mubr.bf16.mxu0 %v998_v46  ;;  %v986_v62 = vmul.f32 %v3357_v50, %v904_v40 }
 0x207   : > { %v3360_v51 = vsel %vm957_vm8, 1.0, %v2928_v1  ;;  %v2366_v52 = vpop.f32.mrf.mxu1  ;;  %2389 = vmatmul.mubr.bf16.vlgmr.msra.gmra.mxu0 %v999_v47 }
 0x208   : > { %vm955_vm9 = vcmp.gt.f32.partialorder %v907_v49, 0.0  ;;  %v989_v54 = vmul.f32 %v3360_v51, %v915_v45  ;;  %v928_v60 = vadd.f32 %v2366_v52, %v3330_v15 }
 0x209   : > { %v3367_v55 = vsel %vm955_vm9, 1.0, %v2928_v1  ;;  %v919_v56 = vpop.f32.mrf.mxu1 }
 0x20a   : > { %v987_v63 = vmul.f32 %v3367_v55, %v907_v49  ;;  %v920_v0 = vadd.f32 %v3330_v15, %v919_v56  ;;  %vm960_vm11 = vcmp.gt.f32.partialorder %v928_v60, 0.0  ;;  %v1001_v11 = vpack.c.bf16 %v989_v54, %v988_v3  ;;  %v2650_v56 = vld [vmem:[%s3319_s14 + $0x10] sm:$0xff]  }
 0x20b   : > { %v2367_v6 = vpop.f32.mrf.mxu1  ;;  %v3383_v17 = vsel %vm960_vm11, 1.0, %v2928_v1  ;;  %2414 = vmatprep.subr.bf16.mxu1 %v2650_v56 }
 0x20c   : > { %vm958_vm10 = vcmp.gt.f32.partialorder %v920_v0, 0.0  ;;  %v931_v7 = vadd.f32 %v2367_v6, %v3330_v15  ;;  %v1000_v8 = vpack.c.bf16 %v987_v63, %v986_v62  ;;  %v992_v32 = vmul.f32 %v3383_v17, %v928_v60  ;;  %2415 = vmatpush3.bf16.msra.mxu1 %v2650_v56  ;;  %v2651_v62 = vld [vmem:[%s3319_s14 + $0x8] sm:$0xff]   ;;  %v2652_v63 = vld [vmem:[%s3319_s14] sm:$0xff]   ;;  %s519_s14 = sand.u32 1, %s2903_s26  }
 0x20d   : > { %v922_v10 = vpop.f32.mrf.mxu1  ;;  %v3377_v13 = vsel %vm958_vm10, 1.0, %v2928_v1  ;;  %2416 = vmatprep.subr.bf16.mxu1 %v2651_v62  ;;  %s2157_s24 = sshll.u32 %s519_s14, 7  ;;  %s3699_s23 = scalar_lea.sflag [#allocation4], %s519_s14 }
 0x20e   : > { %vm961_vm12 = vcmp.gt.f32.partialorder %v931_v7, 0.0  ;;  %v923_v12 = vadd.f32 %v3330_v15, %v922_v10  ;;  %2392 = vmatprep.mubr.bf16.mxu0 %v1000_v8  ;;  %v990_v26 = vmul.f32 %v3377_v13, %v920_v0  ;;  %v3419_v0 = vld [vmem:[%s1024_s29] ss:$0 sm:$0xff]  ;;  %s3604_s17 = scalar_lea.vmem [#allocation11], %s2157_s24 }
 0x20f   : > { %v3380_v14 = vsel %vm961_vm12, 1.0, %v2928_v1  ;;  %v2370_v16 = vpop.f32.mrf.mxu1  ;;  %2393 = vmatmul.mubr.bf16.gmra.mxu0 %v1001_v11  ;;  %v3426_v8 = vld [vmem:[%s1209_s15] ss:$0 sm:$0xff]  ;;  %s1998_s20 = sshll.u32 %s3604_s17, 4  ;;  %s2929_s15 = smov [#allocation11]   ;;  %s3689_s20 = int_to_ptr.vmem [resolvable:$true] %s1998_s20 }
 0x210   : > { %vm959_vm13 = vcmp.gt.f32.partialorder %v923_v12, 0.0  ;;  %v993_v18 = vmul.f32 %v3380_v14, %v931_v7  ;;  %v944_v22 = vadd.f32 %v2370_v16, %v3330_v15  ;;  %2417 = vmatpush3.bf16.msra.mxu1 %v2651_v62  ;;  %s2831_s27 = scalar_lea.vmem %s3689_s20, 2048 }
 0x211   : > { %v3387_v19 = vsel %vm959_vm13, 1.0, %v2928_v1  ;;  %v935_v24 = vpop.f32.mrf.mxu1  ;;  %2418 = vmatprep.subr.bf16.mxu1 %v2652_v63  ;;  %p2832_p10 = scmp.ne.s32.totalorder %s3689_s20, %s2831_s27 }
 0x212   : > { %v991_v27 = vmul.f32 %v3387_v19, %v923_v12  ;;  %v936_v30 = vadd.f32 %v3330_v15, %v935_v24  ;;  %vm964_vm15 = vcmp.gt.f32.partialorder %v944_v22, 0.0  ;;  %v1003_v40 = vpack.c.bf16 %v993_v18, %v992_v32 }
 0x213   : > { %v2371_v34 = vpop.f32.mrf.mxu1  ;;  %v3403_v46 = vsel %vm964_vm15, 1.0, %v2928_v1  ;;  %p2833_p11 = pnand %p2832_p10, %p3042_p4 }
 0x214   : > { %vm962_vm14 = vcmp.gt.f32.partialorder %v936_v30, 0.0  ;;  %v947_v35 = vadd.f32 %v2371_v34, %v3330_v15  ;;  %v1002_v36 = vpack.c.bf16 %v991_v27, %v990_v26  ;;  %v996_v52 = vmul.f32 %v3403_v46, %v944_v22  ;;  %2419 = vmatpush3.bf16.msra.mxu1 %v2652_v63 }
 0x215   : > { %v938_v37 = vpop.f32.mrf.mxu1  ;;  %v3397_v44 = vsel %vm962_vm14, 1.0, %v2928_v1  ;;  %p2834_p13 = pneg %p2833_p11 }
 0x216   : > { %vm965_vm0 = vcmp.gt.f32.partialorder %v947_v35, 0.0  ;;  %v939_v42 = vadd.f32 %v3330_v15, %v938_v37  ;;  %2396 = vmatprep.mubr.bf16.mxu0 %v1002_v36  ;;  %v994_v15 = vmul.f32 %v3397_v44, %v936_v30 }
 0x217   : > { %v3400_v45 = vsel %vm965_vm0, 1.0, %v2928_v1  ;;  %2397 = vmatmul.mubr.bf16.gmra.mxu0 %v1003_v40 }
 0x218   : > { %vm963_vm1 = vcmp.gt.f32.partialorder %v939_v42, 0.0  ;;  %v997_v47 = vmul.f32 %v3400_v45, %v947_v35 }
 0x219   : > { %v3407_v48 = vsel %vm963_vm1, 1.0, %v2928_v1 }
 0x21a   : > { %v995_v49 = vmul.f32 %v3407_v48, %v939_v42  ;;  %v1005_v60 = vpack.c.bf16 %v997_v47, %v996_v52 }
 0x21c   : > { %v1004_v54 = vpack.c.bf16 %v995_v49, %v994_v15 }
 0x21e   : > { %2400 = vmatprep.mubr.bf16.mxu0 %v1004_v54 }
 0x21f   : > { %2401 = vmatmul.mubr.bf16.gmra.mxu0 %v1005_v60 }
 0x2c7   : > { %v2390_v3 = vpop.f32.mrf.mxu0 }
 0x2c8   : > { %v1123_v6 = vadd.f32 %v2390_v3, %v3419_v0 }
 0x2c9   : > { %v1114_v7 = vpop.f32.mrf.mxu0 }
 0x2ca   : > { %vm1179_vm2 = vcmp.gt.f32.partialorder %v1123_v6, 0.0  ;;  %v1115_v10 = vadd.f32 %v3419_v0, %v1114_v7 }
 0x2cb   : > { %v2391_v11 = vpop.f32.mrf.mxu0  ;;  %v1195_v12 = vsel %vm1179_vm2, 1.0, %v2928_v1 }
 0x2cc   : > { %vm1177_vm3 = vcmp.gt.f32.partialorder %v1115_v10, 0.0  ;;  %v1126_v16 = vadd.f32 %v2391_v11, %v3419_v0  ;;  %v1219_v18 = vmul.f32 %v3426_v8, %v1195_v12 }
 0x2cd   : > { %v1193_v22 = vsel %vm1177_vm3, 1.0, %v2928_v1  ;;  %v1117_v24 = vpop.f32.mrf.mxu0 }
 0x2ce   : > { %vm1180_vm4 = vcmp.gt.f32.partialorder %v1126_v16, 0.0  ;;  %v1118_v26 = vadd.f32 %v3419_v0, %v1117_v24  ;;  %v1235_v27 = vmul.f32 %v1219_v18, %v1123_v6  ;;  %v1217_v30 = vmul.f32 %v3426_v8, %v1193_v22 }
 0x2cf   : > { %v2394_v32 = vpop.f32.mrf.mxu0  ;;  %v1196_v34 = vsel %vm1180_vm4, 1.0, %v2928_v1 }
 0x2d0   : > { %vm1178_vm5 = vcmp.gt.f32.partialorder %v1118_v26, 0.0  ;;  %v1139_v35 = vadd.f32 %v2394_v32, %v3419_v0  ;;  %1253 = vadd.xlane.f32.xlu0 %v1235_v27  ;;  %v1220_v36 = vmul.f32 %v3426_v8, %v1196_v34  ;;  %v1233_v42 = vmul.f32 %v1217_v30, %v1115_v10 }
 0x2d1   : > { %v1194_v37 = vsel %vm1178_vm5, 1.0, %v2928_v1  ;;  %v1130_v40 = vpop.f32.mrf.mxu0 }
 0x2d2   : > { %v1218_v47 = vmul.f32 %v3426_v8, %v1194_v37  ;;  %vm1183_vm6 = vcmp.gt.f32.partialorder %v1139_v35, 0.0  ;;  %v1131_v15 = vadd.f32 %v3419_v0, %v1130_v40  ;;  %v1236_v49 = vmul.f32 %v1220_v36, %v1126_v16 }
 0x2d3   : > { %v1199_v52 = vsel %vm1183_vm6, 1.0, %v2928_v1  ;;  %v2395_v54 = vpop.f32.mrf.mxu0  ;;  %v1282_v3 = vpack.c.bf16 %v1220_v36, %v1219_v18 }
 0x2d4   : > { %v1223_v60 = vmul.f32 %v3426_v8, %v1199_v52  ;;  %vm1181_vm7 = vcmp.gt.f32.partialorder %v1131_v15, 0.0  ;;  %v1142_v56 = vadd.f32 %v2395_v54, %v3419_v0  ;;  %1255 = vadd.xlane.f32.xlu1 %v1236_v49  ;;  %1249 = vadd.xlane.f32.xlu0 %v1233_v42  ;;  %v1281_v62 = vpack.c.bf16 %v1218_v47, %v1217_v30 }
 0x2d5   : > { %v1197_v63 = vsel %vm1181_vm7, 1.0, %v2928_v1  ;;  %v1133_v6 = vpop.f32.mrf.mxu0  ;;  %v1234_v7 = vmul.f32 %v1218_v47, %v1118_v26 }
 0x2d6   : > { %vm1184_vm8 = vcmp.gt.f32.partialorder %v1142_v56, 0.0  ;;  %v1134_v10 = vadd.f32 %v3419_v0, %v1133_v6  ;;  %2420 = vmatprep.mubr.bf16.mxu1 %v1281_v62  ;;  %v1221_v11 = vmul.f32 %v3426_v8, %v1197_v63  ;;  %v3447_v12 = vmul.f32 %v1223_v60, %v1139_v35 }
 0x2d7   : > { %v1200_v16 = vsel %vm1184_vm8, 1.0, %v2928_v1  ;;  %v2398_v22 = vpop.f32.mrf.mxu0  ;;  %2421 = vmatmul.mubr.bf16.vlgmr.msra.gmra.mxu1 %v1282_v3 }
 0x2d8   : > { %v1224_v24 = vmul.f32 %v3426_v8, %v1200_v16  ;;  %vm1182_vm9 = vcmp.gt.f32.partialorder %v1134_v10, 0.0  ;;  %v1155_v27 = vadd.f32 %v2398_v22, %v3419_v0  ;;  %1251 = vadd.xlane.f32.xlu1 %v1234_v7  ;;  %v1237_v18 = vmul.f32 %v1221_v11, %v1131_v15 }
 0x2d9   : > { %v1198_v26 = vsel %vm1182_vm9, 1.0, %v2928_v1  ;;  %v1146_v30 = vpop.f32.mrf.mxu0 }
 0x2da   : > { %vm1187_vm10 = vcmp.gt.f32.partialorder %v1155_v27, 0.0  ;;  %v1147_v32 = vadd.f32 %v3419_v0, %v1146_v30  ;;  %1257 = vadd.xlane.f32.xlu0 %v1237_v18  ;;  %v1222_v34 = vmul.f32 %v3426_v8, %v1198_v26  ;;  %v3456_v37 = vmul.f32 %v1224_v24, %v1142_v56 }
 0x2db   : > { %v1203_v35 = vsel %vm1187_vm10, 1.0, %v2928_v1  ;;  %v2399_v36 = vpop.f32.mrf.mxu0  ;;  %v1284_v54 = vpack.c.bf16 %v1224_v24, %v1223_v60 }
 0x2dc   : > { %v1227_v40 = vmul.f32 %v3426_v8, %v1203_v35  ;;  %vm1185_vm11 = vcmp.gt.f32.partialorder %v1147_v32, 0.0  ;;  %v1158_v42 = vadd.f32 %v2399_v36, %v3419_v0  ;;  %v1238_v47 = vmul.f32 %v1222_v34, %v1134_v10 }
 0x2dd   : > { %v1201_v15 = vsel %vm1185_vm11, 1.0, %v2928_v1  ;;  %v1149_v49 = vpop.f32.mrf.mxu0  ;;  %v1283_v52 = vpack.c.bf16 %v1222_v34, %v1221_v11 }
 0x2de   : > { %v1225_v62 = vmul.f32 %v3426_v8, %v1201_v15  ;;  %vm1188_vm12 = vcmp.gt.f32.partialorder %v1158_v42, 0.0  ;;  %v1150_v63 = vadd.f32 %v3419_v0, %v1149_v49  ;;  %1259 = vadd.xlane.f32.xlu1 %v1238_v47  ;;  %v3463_v3 = vmul.f32 %v1227_v40, %v1155_v27 }
 0x2df   : > { %v1204_v56 = vsel %vm1188_vm12, 1.0, %v2928_v1  ;;  %2424 = vmatprep.mubr.bf16.mxu1 %v1283_v52  ;;  %v2402_v6 = vpop.f32.mrf.mxu0 }
 0x2e0   : > { %v1228_v7 = vmul.f32 %v3426_v8, %v1204_v56  ;;  %vm1186_vm13 = vcmp.gt.f32.partialorder %v1150_v63, 0.0  ;;  %v1171_v10 = vadd.f32 %v2402_v6, %v3419_v0  ;;  %2425 = vmatmul.mubr.bf16.gmra.mxu1 %v1284_v54  ;;  %v3468_v11 = vmul.f32 %v1225_v62, %v1147_v32 }
 0x2e1   : > { %v1202_v60 = vsel %vm1186_vm13, 1.0, %v2928_v1  ;;  %v1162_v16 = vpop.f32.mrf.mxu0 }
 0x2e2   : > { %v1226_v22 = vmul.f32 %v3426_v8, %v1202_v60  ;;  %vm1191_vm14 = vcmp.gt.f32.partialorder %v1171_v10, 0.0  ;;  %v1163_v24 = vadd.f32 %v3419_v0, %v1162_v16  ;;  %v3474_v26 = vmul.f32 %v1228_v7, %v1158_v42  ;;  %v2655_v60 = vld [vmem:[%s3488_s25 + $0x28] sm:$0xff]  }
 0x2e3   : > { %v1207_v27 = vsel %vm1191_vm14, 1.0, %v2928_v1  ;;  %v2403_v18 = vpop.f32.mrf.mxu0  ;;  %v1286_v47 = vpack.c.bf16 %v1228_v7, %v1227_v40  ;;  %v2653_v40 = vld [vmem:[%s3488_s25 + $0x38] sm:$0xff]  }
 0x2e4   : > { %v1231_v30 = vmul.f32 %v3426_v8, %v1207_v27  ;;  %vm1189_vm15 = vcmp.gt.f32.partialorder %v1163_v24, 0.0  ;;  %v1174_v32 = vadd.f32 %v2403_v18, %v3419_v0  ;;  %v1285_v34 = vpack.c.bf16 %v1226_v22, %v1225_v62  ;;  %2436 = vmatprep.subr.bf16.mxu0 %v2653_v40  ;;  %v2659_v27 = vld [vmem:[%s3488_s25 + $0x8] sm:$0xff]   ;;  %v2660_v18 = vld [vmem:[%s3488_s25] sm:$0xff]  }
 0x2e5   : > { %v1205_v35 = vsel %vm1189_vm15, 1.0, %v2928_v1  ;;  %v1165_v36 = vpop.f32.mrf.mxu0  ;;  %v3479_v15 = vmul.f32 %v1226_v22, %v1150_v63  ;;  %v2654_v63 = vld [vmem:[%s3488_s25 + $0x30] sm:$0xff]   ;;  %2437 = vmatpush3.bf16.msra.mxu0 %v2653_v40 }
 0x2e6   : > { %v1229_v49 = vmul.f32 %v3426_v8, %v1205_v35  ;;  %vm1192_vm0 = vcmp.gt.f32.partialorder %v1174_v32, 0.0  ;;  %v1166_v52 = vadd.f32 %v3419_v0, %v1165_v36  ;;  %2428 = vmatprep.mubr.bf16.mxu1 %v1285_v34  ;;  %v3483_v42 = vmul.f32 %v1231_v30, %v1171_v10  ;;  %2438 = vmatprep.subr.bf16.mxu0 %v2654_v63  ;;  %v2663_v34 = vld [vmem:[%s3507_s6 + $0x28] sm:$0xff]   ;;  %v2664_v35 = vld [vmem:[%s3507_s6 + $0x20] sm:$0xff]   ;;  %v2665_v36 = vld [vmem:[%s3507_s6 + $0x18] sm:$0xff]  }
 0x2e7   : > { %v1208_v54 = vsel %vm1192_vm0, 1.0, %v2928_v1 }
 0x2e8   : > { %v1232_v56 = vmul.f32 %v3426_v8, %v1208_v54  ;;  %vm1190_vm1 = vcmp.gt.f32.partialorder %v1166_v52, 0.0  ;;  %2429 = vmatmul.mubr.bf16.gmra.mxu1 %v1286_v47  ;;  %v3491_v62 = vmul.f32 %v1229_v49, %v1163_v24  ;;  %v2658_v24 = vld [vmem:[%s3488_s25 + $0x10] sm:$0xff]  }
 0x2e9   : > { %v1206_v0 = vsel %vm1190_vm1, 1.0, %v2928_v1  ;;  %2439 = vmatpush3.bf16.msra.mxu0 %v2654_v63  ;;  %v2656_v1 = vld [vmem:[%s3488_s25 + $0x20] sm:$0xff]  }
 0x2ea   : > { %v1230_v6 = vmul.f32 %v3426_v8, %v1206_v0  ;;  %v3496_v7 = vmul.f32 %v1232_v56, %v1174_v32  ;;  %v1288_v22 = vpack.c.bf16 %v1232_v56, %v1231_v30  ;;  %2440 = vmatprep.subr.bf16.mxu0 %v2655_v60  ;;  %v2657_v8 = vld [vmem:[%s3488_s25 + $0x18] sm:$0xff]   ;;  %v2662_v32 = vld [vmem:[%s3507_s6 + $0x30] sm:$0xff]   ;;  %s2835_s25 = sshll.u32 %s2929_s15, 4  ;;  %s2836_s25 = int_to_ptr.vmem [resolvable:$false] %s2835_s25 }
 0x2eb   : > { %v2661_v30 = vld [vmem:[%s3507_s6 + $0x38] sm:$0xff]   ;;  %p2838_p0 = scmp.lt.s32.totalorder %s3689_s20, %s2836_s25 }
 0x2ec   : > { %v1287_v10 = vpack.c.bf16 %v1230_v6, %v1229_v49  ;;  %v3499_v16 = vmul.f32 %v1230_v6, %v1166_v52  ;;  %2500 = vmatprep.subr.bf16.mxu1 %v2661_v30 }
 0x2ed   : > { %2441 = vmatpush3.bf16.msra.mxu0 %v2655_v60  ;;  %2508 = vmatpush3.bf16.msra.mxu1 %v2661_v30 }
 0x2ee   : > { %2432 = vmatprep.mubr.bf16.mxu1 %v1287_v10  ;;  %2442 = vmatprep.subr.bf16.mxu0 %v2656_v1 }
 0x2ef   : > { %2501 = vmatprep.subr.bf16.mxu1 %v2662_v32 }
 0x2f0   : > { %2433 = vmatmul.mubr.bf16.gmra.mxu1 %v1288_v22 }
 0x2f1   : > { %2443 = vmatpush3.bf16.msra.mxu0 %v2656_v1  ;;  %2509 = vmatpush3.bf16.msra.mxu1 %v2662_v32 }
 0x2f2   : > { %2444 = vmatprep.subr.bf16.mxu0 %v2657_v8  ;;  %2502 = vmatprep.subr.bf16.mxu1 %v2663_v34 }
 0x2f5   : > { %2445 = vmatpush3.bf16.msra.mxu0 %v2657_v8  ;;  %2510 = vmatpush3.bf16.msra.mxu1 %v2663_v34 }
 0x2f6   : > { %2446 = vmatprep.subr.bf16.mxu0 %v2658_v24  ;;  %2503 = vmatprep.subr.bf16.mxu1 %v2664_v35 }
 0x2f9   : > { %2447 = vmatpush3.bf16.msra.mxu0 %v2658_v24  ;;  %2511 = vmatpush3.bf16.msra.mxu1 %v2664_v35 }
 0x2fa   : > { %2448 = vmatprep.subr.bf16.mxu0 %v2659_v27  ;;  %2504 = vmatprep.subr.bf16.mxu1 %v2665_v36 }
 0x2fd   : > { %2449 = vmatpush3.bf16.msra.mxu0 %v2659_v27  ;;  %2512 = vmatpush3.bf16.msra.mxu1 %v2665_v36 }
 0x2fe   : > { %2450 = vmatprep.subr.bf16.mxu0 %v2660_v18 }
 0x301   : > { %2451 = vmatpush3.bf16.msra.mxu0 %v2660_v18 }
 0x302   : > { %2468 = vmatprep.subr.bf16.mxu0 %v2661_v30 }
 0x397   : > { %v2422_v47 = vpop.f32.mrf.mxu1 }
 0x398   : > { %v1454_v63 = vmul.f32 %v2422_v47, %v3343_v31 }
 0x399   : > { %v1389_v49 = vpop.f32.mrf.mxu1 }
 0x39a   : > { %v1452_v40 = vmul.f32 %v1389_v49, %v3337_v28 }
 0x39b   : > { %v2423_v52 = vpop.f32.mrf.mxu1 }
 0x39c   : > { %v1455_v54 = vmul.f32 %v2423_v52, %v3340_v29 }
 0x39d   : > { %v1392_v56 = vpop.f32.mrf.mxu1 }
 0x39e   : > { %v1453_v0 = vmul.f32 %v1392_v56, %v3347_v33  ;;  %v1469_v60 = vpack.c.bf16 %v1455_v54, %v1454_v63  ;;  %v2666_v63 = vld [vmem:[%s3507_s6 + $0x10] sm:$0xff]  }
 0x39f   : > { %2505 = vmatprep.subr.bf16.mxu1 %v2666_v63 }
 0x3a0   : > { %v1468_v6 = vpack.c.bf16 %v1453_v0, %v1452_v40  ;;  %v2426_v10 = vpop.f32.mrf.mxu1  ;;  %2513 = vmatpush3.bf16.msra.mxu1 %v2666_v63 }
 0x3a1   : > { %v1458_v33 = vmul.f32 %v2426_v10, %v3363_v53 }
 0x3a2   : > { %v1405_v22 = vpop.f32.mrf.mxu1  ;;  %2452 = vmatprep.mubr.bf16.mxu0 %v1468_v6 }
 0x3a3   : > { %2453 = vmatmul.mubr.bf16.vlgmr.msra.gmra.mxu0 %v1469_v60  ;;  %v1456_v29 = vmul.f32 %v1405_v22, %v3357_v50 }
 0x3a4   : > { %v2427_v1 = vpop.f32.mrf.mxu1  ;;  %2469 = vmatpush3.bf16.msra.mxu0 %v2661_v30 }
 0x3a5   : > { %2470 = vmatprep.subr.bf16.mxu0 %v2662_v32  ;;  %v1459_v8 = vmul.f32 %v2427_v1, %v3360_v51 }
 0x3a6   : > { %v1408_v24 = vpop.f32.mrf.mxu1 }
 0x3a7   : > { %v1457_v28 = vmul.f32 %v1408_v24, %v3367_v55  ;;  %v1471_v18 = vpack.c.bf16 %v1459_v8, %v1458_v33 }
 0x3a8   : > { %v2430_v27 = vpop.f32.mrf.mxu1  ;;  %2471 = vmatpush3.bf16.msra.mxu0 %v2662_v32 }
 0x3a9   : > { %v1470_v31 = vpack.c.bf16 %v1457_v28, %v1456_v29  ;;  %2472 = vmatprep.subr.bf16.mxu0 %v2663_v34  ;;  %v1462_v53 = vmul.f32 %v2430_v27, %v3383_v17 }
 0x3aa   : > { %v1421_v47 = vpop.f32.mrf.mxu1 }
 0x3ab   : > { %2456 = vmatprep.mubr.bf16.mxu0 %v1470_v31  ;;  %v1460_v50 = vmul.f32 %v1421_v47, %v3377_v13 }
 0x3ac   : > { %v2431_v49 = vpop.f32.mrf.mxu1  ;;  %2457 = vmatmul.mubr.bf16.gmra.mxu0 %v1471_v18 }
 0x3ad   : > { %2473 = vmatpush3.bf16.msra.mxu0 %v2663_v34  ;;  %v1463_v30 = vmul.f32 %v2431_v49, %v3380_v14 }
 0x3ae   : > { %v1424_v51 = vpop.f32.mrf.mxu1  ;;  %2474 = vmatprep.subr.bf16.mxu0 %v2664_v35 }
 0x3af   : > { %v1461_v55 = vmul.f32 %v1424_v51, %v3387_v19  ;;  %v1473_v54 = vpack.c.bf16 %v1463_v30, %v1462_v53 }
 0x3b0   : > { %v2434_v52 = vpop.f32.mrf.mxu1 }
 0x3b1   : > { %v1472_v32 = vpack.c.bf16 %v1461_v55, %v1460_v50  ;;  %2475 = vmatpush3.bf16.msra.mxu0 %v2664_v35  ;;  %v1466_v17 = vmul.f32 %v2434_v52, %v3403_v46  ;;  %v3537_v46 = vld [vmem:[%s1826_s19] ss:$0 sm:$0xff] }
 0x3b2   : > { %v1437_v56 = vpop.f32.mrf.mxu1  ;;  %2476 = vmatprep.subr.bf16.mxu0 %v2665_v36 }
 0x3b3   : > { %2460 = vmatprep.mubr.bf16.mxu0 %v1472_v32  ;;  %v1464_v13 = vmul.f32 %v1437_v56, %v3397_v44  ;;  %v2668_v44 = vld [vmem:[%s3507_s6] sm:$0xff]  }
 0x3b4   : > { %v2435_v40 = vpop.f32.mrf.mxu1  ;;  %2461 = vmatmul.mubr.bf16.gmra.mxu0 %v1473_v54 }
 0x3b5   : > { %2477 = vmatpush3.bf16.msra.mxu0 %v2665_v36  ;;  %v1467_v14 = vmul.f32 %v2435_v40, %v3400_v45  ;;  %v2667_v36 = vld [vmem:[%s3507_s6 + $0x8] sm:$0xff]   ;;  %s2837_s6 = scalar_lea.vmem %s2836_s25, 4096 }
 0x3b6   : > { %v1440_v34 = vpop.f32.mrf.mxu1  ;;  %2478 = vmatprep.subr.bf16.mxu0 %v2666_v63  ;;  %2506 = vmatprep.subr.bf16.mxu1 %v2667_v36  ;;  %p2839_p1 = scmp.lt.s32.totalorder %s2837_s6, %s2831_s27 }
 0x3b7   : > { %v1465_v19 = vmul.f32 %v1440_v34, %v3407_v48  ;;  %v1475_v0 = vpack.c.bf16 %v1467_v14, %v1466_v17  ;;  %2514 = vmatpush3.bf16.msra.mxu1 %v2667_v36 }
 0x3b8   : > { %2507 = vmatprep.subr.bf16.mxu1 %v2668_v44  ;;  %p2840_p5 = por %p2839_p1, %p2838_p0 }
 0x3b9   : > { %v1474_v35 = vpack.c.bf16 %v1465_v19, %v1464_v13  ;;  %2479 = vmatpush3.bf16.msra.mxu0 %v2666_v63 }
 0x3ba   : > { %2480 = vmatprep.subr.bf16.mxu0 %v2667_v36  ;;  %p2841_p3 = pnand %p2840_p5, %p2834_p13 }
 0x3bb   : > { %2464 = vmatprep.mubr.bf16.mxu0 %v1474_v35  ;;  %2515 = vmatpush3.bf16.msra.mxu1 %v2668_v44 }
 0x3bc   : > { %2465 = vmatmul.mubr.bf16.gmra.mxu0 %v1475_v0 }
 0x3bd   : > { %2481 = vmatpush3.bf16.msra.mxu0 %v2667_v36 }
 0x3be   : > { %2482 = vmatprep.subr.bf16.mxu0 %v2668_v44 }
 0x3c1   : > { %2483 = vmatpush3.bf16.msra.mxu0 %v2668_v44 }
 0x463   : > { %v2454_v45 = vpop.f32.mrf.mxu0 }
 0x464   : > { %v1641_v48 = vmul.f32 %v2454_v45, %v3246_v5 }
 0x465   : > { %v1576_v6 = vpop.f32.mrf.mxu0 }
 0x466   : > { %v1639_v10 = vmul.f32 %v1576_v6, %v3243_v4  ;;  %v1836_v60 = vmul.f32 %v3537_v46, %v1641_v48 }
 0x467   : > { %v2455_v22 = vpop.f32.mrf.mxu0 }
 0x468   : > { %v1642_v1 = vmul.f32 %v2455_v22, %v3240_v2  ;;  %1854 = vadd.xlane.f32.xlu1 %v1836_v60  ;;  %v1834_v8 = vmul.f32 %v3537_v46, %v1639_v10 }
 0x469   : > { %v1579_v24 = vpop.f32.mrf.mxu0 }
 0x46a   : > { %v1640_v29 = vmul.f32 %v1579_v24, %v3251_v9  ;;  %1850 = vadd.xlane.f32.xlu0 %v1834_v8  ;;  %v1837_v28 = vmul.f32 %v3537_v46, %v1642_v1  ;;  %v1656_v4 = vpack.c.bf16 %v1642_v1, %v1641_v48 }
 0x46c   : > { %v1655_v33 = vpack.c.bf16 %v1640_v29, %v1639_v10  ;;  %v2458_v27 = vpop.f32.mrf.mxu0  ;;  %1856 = vadd.xlane.f32.xlu1 %v1837_v28  ;;  %v1835_v5 = vmul.f32 %v3537_v46, %v1640_v29 }
 0x46d   : > { %v1645_v31 = vmul.f32 %v2458_v27, %v3266_v23 }
 0x46e   : > { %v1592_v18 = vpop.f32.mrf.mxu0  ;;  %2484 = vmatprep.mubr.bf16.mxu0 %v1655_v33  ;;  %1852 = vadd.xlane.f32.xlu0 %v1835_v5 }
 0x46f   : > { %2485 = vmatmul.mubr.bf16.vlgmr.msra.gmra.mxu0 %v1656_v4  ;;  %v1643_v2 = vmul.f32 %v1592_v18, %v3260_v20  ;;  %v1840_v9 = vmul.f32 %v3537_v46, %v1645_v31 }
 0x470   : > { %v2459_v47 = vpop.f32.mrf.mxu0 }
 0x471   : > { %v1646_v49 = vmul.f32 %v2459_v47, %v3263_v21  ;;  %v1838_v23 = vmul.f32 %v3537_v46, %v1643_v2 }
 0x472   : > { %v1595_v30 = vpop.f32.mrf.mxu0  ;;  %1862 = vadd.xlane.f32.xlu0 %v1840_v9 }
 0x473   : > { %v1644_v51 = vmul.f32 %v1595_v30, %v3270_v25  ;;  %v1841_v50 = vmul.f32 %v3537_v46, %v1646_v49  ;;  %v1658_v32 = vpack.c.bf16 %v1646_v49, %v1645_v31 }
 0x474   : > { %v2462_v55 = vpop.f32.mrf.mxu0 }
 0x475   : > { %v1657_v53 = vpack.c.bf16 %v1644_v51, %v1643_v2  ;;  %v1649_v52 = vmul.f32 %v2462_v55, %v3286_v41  ;;  %1864 = vadd.xlane.f32.xlu1 %v1841_v50  ;;  %v1839_v54 = vmul.f32 %v3537_v46, %v1644_v51  ;;  %v1930_v2 = vlaneseq }
 0x476   : > { %v1608_v20 = vpop.f32.mrf.mxu0  ;;  %1858 = vadd.xlane.f32.xlu0 %v1838_v23 }
 0x477   : > { %2488 = vmatprep.mubr.bf16.mxu1 %v1657_v53  ;;  %v1647_v21 = vmul.f32 %v1608_v20, %v3280_v38  ;;  %v1844_v25 = vmul.f32 %v3537_v46, %v1649_v52  ;;  %v3594_v30 = vand.u32 127, %v1930_v2 }
 0x478   : > { %v2463_v56 = vpop.f32.mrf.mxu0  ;;  %2489 = vmatmul.mubr.bf16.vlgmr.msra.gmra.mxu1 %v1658_v32 }
 0x479   : > { %v1650_v40 = vmul.f32 %v2463_v56, %v3283_v39  ;;  %1860 = vadd.xlane.f32.xlu1 %v1839_v54  ;;  %v1842_v19 = vmul.f32 %v3537_v46, %v1647_v21  ;;  %vm1933_vm2 = vcmp.eq.s32.totalorder %v3594_v30, 13  ;;  %vm1932_vm3 = vcmp.eq.s32.totalorder %v3594_v30, 12 }
 0x47a   : > { %v1611_v14 = vpop.f32.mrf.mxu0  ;;  %1870 = vadd.xlane.f32.xlu0 %v1844_v25 }
 0x47b   : > { %v1648_v41 = vmul.f32 %v1611_v14, %v3290_v43  ;;  %v1845_v34 = vmul.f32 %v3537_v46, %v1650_v40  ;;  %v1660_v38 = vpack.c.bf16 %v1650_v40, %v1649_v52 }
 0x47c   : > { %v2466_v13 = vpop.f32.mrf.mxu0 }
 0x47d   : > { %v1659_v17 = vpack.c.bf16 %v1648_v41, %v1647_v21  ;;  %v1653_v35 = vmul.f32 %v2466_v13, %v3306_v59  ;;  %1872 = vadd.xlane.f32.xlu1 %v1845_v34  ;;  %v1843_v39 = vmul.f32 %v3537_v46, %v1648_v41 }
 0x47e   : > { %v1624_v0 = vpop.f32.mrf.mxu0  ;;  %1866 = vadd.xlane.f32.xlu0 %v1842_v19 }
 0x47f   : > { %2492 = vmatprep.mubr.bf16.mxu1 %v1659_v17  ;;  %v1651_v63 = vmul.f32 %v1624_v0, %v3300_v57  ;;  %v1848_v43 = vmul.f32 %v3537_v46, %v1653_v35 }
 0x480   : > { %v2467_v36 = vpop.f32.mrf.mxu0  ;;  %2493 = vmatmul.mubr.bf16.gmra.mxu1 %v1660_v38 }
 0x481   : > { %v1654_v44 = vmul.f32 %v2467_v36, %v3303_v58  ;;  %1868 = vadd.xlane.f32.xlu1 %v1843_v39  ;;  %v1846_v6 = vmul.f32 %v3537_v46, %v1651_v63  ;;  %v1254_v58 = vpop.xlane.xlu0 %1253 }
 0x482   : > { %v1627_v45 = vpop.f32.mrf.mxu0  ;;  %1878 = vadd.xlane.f32.xlu0 %v1848_v43 }
 0x483   : > { %v1652_v59 = vmul.f32 %v1627_v45, %v3310_v61  ;;  %v1849_v48 = vmul.f32 %v3537_v46, %v1654_v44  ;;  %v1662_v60 = vpack.c.bf16 %v1654_v44, %v1653_v35  ;;  %v3581_v61 = vpop.xlane.xlu1 %1255 }
 0x485   : > { %v1661_v10 = vpack.c.bf16 %v1652_v59, %v1651_v63  ;;  %1880 = vadd.xlane.f32.xlu1 %v1849_v48  ;;  %v1847_v57 = vmul.f32 %v3537_v46, %v1652_v59 }
 0x486   : > { %1874 = vadd.xlane.f32.xlu0 %v1846_v6 }
 0x487   : > { %2496 = vmatprep.mubr.bf16.mxu1 %v1661_v10 }
 0x488   : > { %2497 = vmatmul.mubr.bf16.gmra.mxu1 %v1662_v60 }
 0x489   : > { %1876 = vadd.xlane.f32.xlu1 %v1847_v57 }
 0x48a   : > { %1261 = vadd.xlane.f32.xlu0 %v3447_v12  ;;  %v3583_v12 = vpop.xlane.xlu0 %1249 }
 0x48d   : > { %1263 = vadd.xlane.f32.xlu1 %v3456_v37 }
 0x48e   : > { %1265 = vadd.xlane.f32.xlu0 %v3468_v11  ;;  %v3585_v37 = vpop.xlane.xlu0 %1257  ;;  %v3587_v11 = vpop.xlane.xlu1 %1251 }
 0x491   : > { %1267 = vadd.xlane.f32.xlu1 %v3479_v15 }
 0x492   : > { %1269 = vadd.xlane.f32.xlu0 %v3463_v3  ;;  %v3589_v15 = vpop.xlane.xlu1 %1259 }
 0x495   : > { %1271 = vadd.xlane.f32.xlu1 %v3474_v26 }
 0x496   : > { %1273 = vadd.xlane.f32.xlu0 %v3491_v62 }
 0x499   : > { %1275 = vadd.xlane.f32.xlu1 %v3499_v16 }
 0x49a   : > { %1277 = vadd.xlane.f32.xlu0 %v3483_v42 }
 0x49d   : > { %1279 = vadd.xlane.f32.xlu1 %v3496_v7 }
 0x4f1   : > { %v1855_v26 = vpop.xlane.xlu1 %1854 }
 0x4f2   : > { %v1884_v8 = vand.u32 2147483647, %v1855_v26 }
 0x4f3   : > { %v1851_v3 = vpop.xlane.xlu0 %1850 }
 0x4f4   : > { %v1882_v24 = vand.u32 2147483647, %v1851_v3  ;;  %2669 = vlog2.f32 %v1884_v8 }
 0x4f5   : > { %v1857_v46 = vpop.xlane.xlu1 %1856 }
 0x4f6   : > { %v1885_v28 = vand.u32 2147483647, %v1857_v46  ;;  %2671 = vlog2.f32 %v1882_v24 }
 0x4f7   : > { %v1853_v62 = vpop.xlane.xlu0 %1852 }
 0x4f8   : > { %v1883_v27 = vand.u32 2147483647, %v1853_v62  ;;  %2673 = vlog2.f32 %v1885_v28 }
 0x4fa   : > { %2675 = vlog2.f32 %v1883_v27 }
 0x4fb   : > { %v1863_v16 = vpop.xlane.xlu0 %1862 }
 0x4fc   : > { %v1888_v5 = vand.u32 2147483647, %v1863_v16 }
 0x4fe   : > { %v1865_v22 = vpop.xlane.xlu1 %1864  ;;  %2677 = vlog2.f32 %v1888_v5 }
 0x4ff   : > { %v1859_v42 = vpop.xlane.xlu0 %1858  ;;  %v1889_v47 = vand.u32 2147483647, %v1865_v22 }
 0x500   : > { %v1886_v31 = vand.u32 2147483647, %v1859_v42 }
 0x501   : > { %v2670_v51 = vpop.eup %2669 }
 0x502   : > { %v1861_v1 = vpop.xlane.xlu1 %1860  ;;  %2679 = vlog2.f32 %v1886_v31  ;;  %v1903_v52 = vmul.f32 0.6931472, %v2670_v51 }
 0x503   : > { %v1871_v7 = vpop.xlane.xlu0 %1870  ;;  %v1887_v9 = vand.u32 2147483647, %v1861_v1  ;;  %2681 = vlog2.f32 %v1889_v47  ;;  %v2672_v23 = vpop.eup %2671 }
 0x504   : > { %v1892_v50 = vand.u32 2147483647, %v1871_v7  ;;  %v1899_v56 = vmul.f32 0.6931472, %v2672_v23 }
 0x505   : > { %2683 = vlog2.f32 %v1887_v9  ;;  %v2674_v32 = vpop.eup %2673 }
 0x506   : > { %v1873_v29 = vpop.xlane.xlu1 %1872  ;;  %2685 = vlog2.f32 %v1892_v50  ;;  %v1905_v19 = vmul.f32 0.6931472, %v2674_v32 }
 0x507   : > { %v1867_v33 = vpop.xlane.xlu0 %1866  ;;  %v1893_v20 = vand.u32 2147483647, %v1873_v29  ;;  %v2676_v40 = vpop.eup %2675 }
 0x508   : > { %v1890_v53 = vand.u32 2147483647, %v1867_v33  ;;  %v1901_v63 = vmul.f32 0.6931472, %v2676_v40 }
 0x50a   : > { %v1869_v4 = vpop.xlane.xlu1 %1868  ;;  %2687 = vlog2.f32 %v1890_v53 }
 0x50b   : > { %v1879_v18 = vpop.xlane.xlu0 %1878  ;;  %v1891_v14 = vand.u32 2147483647, %v1869_v4  ;;  %2689 = vlog2.f32 %v1893_v20  ;;  %v2678_v39 = vpop.eup %2677 }
 0x50c   : > { %v1896_v35 = vand.u32 2147483647, %v1879_v18  ;;  %v1911_v10 = vmul.f32 0.6931472, %v2678_v39 }
 0x50d   : > { %2691 = vlog2.f32 %v1891_v14 }
 0x50e   : > { %v3591_v49 = vpop.xlane.xlu1 %1880  ;;  %2693 = vlog2.f32 %v1896_v35 }
 0x50f   : > { %v1875_v55 = vpop.xlane.xlu0 %1874  ;;  %v2680_v48 = vpop.eup %2679  ;;  %v1897_v60 = vand.u32 2147483647, %v3591_v49 }
 0x510   : > { %v1894_v43 = vand.u32 2147483647, %v1875_v55 }
 0x512   : > { %v1877_v54 = vpop.xlane.xlu1 %1876  ;;  %2695 = vlog2.f32 %v1894_v43 }
 0x513   : > { %v1262_v41 = vpop.xlane.xlu0 %1261  ;;  %v1895_v26 = vand.u32 2147483647, %v1877_v54  ;;  %2697 = vlog2.f32 %v1897_v60 }
 0x515   : > { %2699 = vlog2.f32 %v1895_v26 }
 0x516   : > { %v1264_v44 = vpop.xlane.xlu1 %1263 }
 0x517   : > { %v1266_v57 = vpop.xlane.xlu0 %1265 }
 0x51a   : > { %v1268_v1 = vpop.xlane.xlu1 %1267 }
 0x51b   : > { %v1270_v28 = vpop.xlane.xlu0 %1269 }
 0x51e   : > { %v1272_v49 = vpop.xlane.xlu1 %1271 }
 0x52f   : > { %v2486_v21 = vpop.f32.mrf.mxu0 }
 0x530   : > { %v1936_v25 = vsel %vm1933_vm2, %v1903_v52, %v2486_v21  ;;  %v1274_v52 = vpop.xlane.xlu0 %1273 }
 0x531   : > { %v1952_v34 = vsel %vm1932_vm3, %v1254_v58, %v1936_v25  ;;  %v1763_v13 = vpop.f32.mrf.mxu0 }
 0x532   : > { %1968 = vst [vmem:[%s3604_s17 + $0x10] sm:$0xff] %v1952_v34  ;;  %v1934_v17 = vsel %vm1933_vm2, %v1899_v56, %v1763_v13  ;;  %v1276_v34 = vpop.xlane.xlu1 %1275 }
 0x533   : > { %v1950_v38 = vsel %vm1932_vm3, %v3583_v12, %v1934_v17  ;;  %v2487_v0 = vpop.f32.mrf.mxu0  ;;  %v2682_v12 = vpop.eup %2681 }
 0x534   : > { %1966 = vst [vmem:[%s3604_s17] sm:$0xff] %v1950_v38  ;;  %v1937_v36 = vsel %vm1933_vm2, %v1905_v19, %v2487_v0  ;;  %v2684_v46 = vpop.eup %2683  ;;  %v1913_v42 = vmul.f32 0.6931472, %v2682_v12  ;;  %v1278_v0 = vpop.xlane.xlu0 %1277 }
 0x535   : > { %v1953_v45 = vsel %vm1932_vm3, %v3581_v61, %v1937_v36  ;;  %v1766_v59 = vpop.f32.mrf.mxu0  ;;  %v1907_v61 = vmul.f32 0.6931472, %v2680_v48  ;;  %v2686_v7 = vpop.eup %2685  ;;  %v1909_v29 = vmul.f32 0.6931472, %v2684_v46 }
 0x536   : > { %1969 = vst [vmem:[%s3604_s17 + $0x18] sm:$0xff] %v1953_v45  ;;  %v1935_v6 = vsel %vm1933_vm2, %v1901_v63, %v1766_v59  ;;  %v2688_v27 = vpop.eup %2687  ;;  %v1919_v31 = vmul.f32 0.6931472, %v2686_v7 }
 0x537   : > { %v1951_v58 = vsel %vm1932_vm3, %v3587_v11, %v1935_v6  ;;  %v2690_v18 = vpop.eup %2689  ;;  %v1915_v9 = vmul.f32 0.6931472, %v2688_v27 }
 0x538   : > { %1967 = vst [vmem:[%s3604_s17 + $0x8] sm:$0xff] %v1951_v58  ;;  %v2490_v3 = vpop.f32.mrf.mxu1  ;;  %v2692_v50 = vpop.eup %2691  ;;  %v1921_v53 = vmul.f32 0.6931472, %v2690_v18 }
 0x539   : > { %v1940_v62 = vsel %vm1933_vm2, %v1911_v10, %v2490_v3  ;;  %v2694_v32 = vpop.eup %2693  ;;  %v1917_v21 = vmul.f32 0.6931472, %v2692_v50  ;;  %v1280_v10 = vpop.xlane.xlu1 %1279 }
 0x53a   : > { %v1956_v16 = vsel %vm1932_vm3, %v1262_v41, %v1940_v62  ;;  %v1779_v22 = vpop.f32.mrf.mxu1  ;;  %v2696_v25 = vpop.eup %2695  ;;  %v1927_v41 = vmul.f32 0.6931472, %v2694_v32 }
 0x53b   : > { %1972 = vst [vmem:[%s3604_s17 + $0x30] sm:$0xff] %v1956_v16  ;;  %v1938_v11 = vsel %vm1933_vm2, %v1907_v61, %v1779_v22  ;;  %v2698_v19 = vpop.eup %2697  ;;  %v1923_v38 = vmul.f32 0.6931472, %v2696_v25 }
 0x53c   : > { %v1954_v8 = vsel %vm1932_vm3, %v3585_v37, %v1938_v11  ;;  %v2491_v24 = vpop.f32.mrf.mxu1  ;;  %v2700_v63 = vpop.eup %2699 }
 0x53d   : > { %1970 = vst [vmem:[%s3604_s17 + $0x20] sm:$0xff] %v1954_v8  ;;  %v1941_v33 = vsel %vm1933_vm2, %v1913_v42, %v2491_v24  ;;  %v1925_v6 = vmul.f32 0.6931472, %v2700_v63 }
 0x53e   : > { %v1957_v5 = vsel %vm1932_vm3, %v1264_v44, %v1941_v33  ;;  %v1782_v4 = vpop.f32.mrf.mxu1  ;;  %v1929_v44 = vmul.f32 0.6931472, %v2698_v19 }
 0x53f   : > { %1973 = vst [vmem:[%s3604_s17 + $0x38] sm:$0xff] %v1957_v5  ;;  %v1939_v37 = vsel %vm1933_vm2, %v1909_v29, %v1782_v4 }
 0x540   : > { %v1955_v2 = vsel %vm1932_vm3, %v3589_v15, %v1939_v37  ;;  %v2494_v47 = vpop.f32.mrf.mxu1 }
 0x541   : > { %1971 = vst [vmem:[%s3604_s17 + $0x28] sm:$0xff] %v1955_v2  ;;  %v1944_v51 = vsel %vm1933_vm2, %v1919_v31, %v2494_v47 }
 0x542   : > { %v1960_v55 = vsel %vm1932_vm3, %v1270_v28, %v1944_v51  ;;  %v1795_v23 = vpop.f32.mrf.mxu1 }
 0x543   : > { %1976 = vst [vmem:[%s3604_s17 + $0x50] sm:$0xff] %v1960_v55  ;;  %v1942_v15 = vsel %vm1933_vm2, %v1915_v9, %v1795_v23 }
 0x544   : > { %v1958_v20 = vsel %vm1932_vm3, %v1266_v57, %v1942_v15  ;;  %v2495_v54 = vpop.f32.mrf.mxu1 }
 0x545   : > { %1974 = vst [vmem:[%s3604_s17 + $0x40] sm:$0xff] %v1958_v20  ;;  %v1945_v56 = vsel %vm1933_vm2, %v1921_v53, %v2495_v54 }
 0x546   : > { %v1961_v40 = vsel %vm1932_vm3, %v1272_v49, %v1945_v56  ;;  %v1798_v14 = vpop.f32.mrf.mxu1 }
 0x547   : > { %1977 = vst [vmem:[%s3604_s17 + $0x58] sm:$0xff] %v1961_v40  ;;  %v1943_v13 = vsel %vm1933_vm2, %v1917_v21, %v1798_v14 }
 0x548   : > { %v1959_v17 = vsel %vm1932_vm3, %v1268_v1, %v1943_v13  ;;  %v2498_v35 = vpop.f32.mrf.mxu1 }
 0x549   : > { %1975 = vst [vmem:[%s3604_s17 + $0x48] sm:$0xff] %v1959_v17  ;;  %v1948_v39 = vsel %vm1933_vm2, %v1927_v41, %v2498_v35 }
 0x54a   : > { %v1964_v36 = vsel %vm1932_vm3, %v1278_v0, %v1948_v39  ;;  %v1811_v43 = vpop.f32.mrf.mxu1 }
 0x54b   : > { %1980 = vst [vmem:[%s3604_s17 + $0x70] sm:$0xff] %v1964_v36  ;;  %v1946_v45 = vsel %vm1933_vm2, %v1923_v38, %v1811_v43 }
 0x54c   : > { %v1962_v59 = vsel %vm1932_vm3, %v1274_v52, %v1946_v45  ;;  %v2499_v48 = vpop.f32.mrf.mxu1 }
 0x54d   : > { %1978 = vst [vmem:[%s3604_s17 + $0x60] sm:$0xff] %v1962_v59  ;;  %v1949_v60 = vsel %vm1933_vm2, %v1929_v44, %v2499_v48 }
 0x54e   : > { %v1965_v57 = vsel %vm1932_vm3, %v1280_v10, %v1949_v60  ;;  %v1814_v58 = vpop.f32.mrf.mxu1 }
 0x54f   : > { %1981 = vst [vmem:[%s3604_s17 + $0x78] sm:$0xff] %v1965_v57  ;;  %v1947_v12 = vsel %vm1933_vm2, %v1925_v6, %v1814_v58 }
 0x550   : > { %v1963_v3 = vsel %vm1932_vm3, %v1276_v34, %v1947_v12 }
 0x551   : > { %1979 = vst [vmem:[%s3604_s17 + $0x68] sm:$0xff] %v1963_v3 }
 0x552   : > { %2844 = shalt.err (!%p2841_p3)
}
 0x553   : > { %s2845_s21 = scalar_lea.hbm %s3687_s28, 2048  ;;  %s2849_s14 = scalar_lea.hbm %s3757_s13, 8192 }
 0x554   : > { %p2846_p6 = scmp.ne.s32.totalorder %s3687_s28, %s2845_s21  ;;  %p2850_p9 = scmp.lt.s32.totalorder %s3687_s28, %s3757_s13 }
 0x555   : > { %p2851_p12 = scmp.lt.s32.totalorder %s2849_s14, %s2845_s21 }
 0x556   : > { %p2847_p8 = pnand %p2846_p6, %p3042_p4 }
 0x557   : > { %p2852_p2 = por %p2851_p12, %p2850_p9 }
 0x558   : > { %p2848_p7 = pneg %p2847_p8 }
 0x55a   : > { %p2853_p10 = pnand %p2852_p2, %p2848_p7 }
 0x55c   : > { %2856 = shalt.err (!%p2853_p10)
}
 0x55d   : > { %s2930_s16 = smov 128   ;;  %s2931_s30 = smov 8  }
 0x55e   : > { %2537 = dma.vmem_to_hbm [thread:$0]  (%p3042_p4), %s3689_s20, 2048, %s3687_s28, %s3699_s23, %s2930_s16, %s2930_s16, %s2931_s30  }
 0x55f PF: > { %s3780_s29 = sld [smem:[#allocation19_spill]] }
 0x560   : > { %s3781_s27 = sld [smem:[#allocation16_spill]] }
 0x561   : > { %s3782_s15 = sld [smem:[#allocation21_spill]] }
 0x565   : > { %p2569_p11 = scmp.ge.s32.totalorder %s3780_s29, 2 }
 0x566   : > { %s2013_s25 = sand.u32 1, %s3781_s27  }
 0x567   : > { %p3783_p13 = scmp.ne.s32.totalorder %s3782_s15, 0  ;;  %s2014_s6 = scalar_lea.sflag [#allocation4], %s2013_s25 }
 0x569   : > { %p2556_p0 = pnand %p2569_p11, %p3783_p13 }
 0x56b   : > { %p2557_p1 = pneg %p2556_p0 }
 0x56d   : > { %2894 = dma.done.wait (%p2557_p1), %s2014_s6, 2048  }
 0x56e   : > { %2896 = vsyncadd (%p2557_p1), %s2014_s6, 4294965248  ;;  %s29_s30 = sadd.s32 1, %s3780_s29   ;;  %s3784_s21 = sld [smem:[#allocation17_spill]] }
 0x56f   : > { %p26_p5 = scmp.ge.s32.totalorder %s29_s30, 6   ;;  %s3785_s27 = sld [smem:[#allocation22_spill]] }
 0x570   : > { %s3786_s28 = sld [smem:[#allocation18_spill]]  ;;  %s3788_s25 = smov %s2903_s26 }
 0x571   : > { %s3787_s29 = sld [smem:[#allocation20_spill]]  ;;  %28 = sbr.rel (!%p26_p5) target bundleno = 9 (0x9), region = 140 }
 0x574   : > { %s3789_s26 = smov %s3784_s21 }
 0x576   :  { %2019 = vsyncpa [#allocation3], 1 }
 0x577   :  { %2021 = vsyncpa [#allocation3 + $0x1], 1 }
 0x578   :  { %2022 = vsyncpa [#allocation6], 1 }
 0x579   :  { %2023 = vsyncpa [#allocation9], 1 }
 0x57a   :  { %2024 = vsyncpa [#allocation4], 1 }
 0x57b   :  { %2026 = vsyncpa [#allocation4 + $0x1], 1 }

</bundles_post_ra>
